<compile_context>
chip_gen: v6e
topology: v6e:2x2x1
jax: 0.10.0
libtpu: 0.0.40
codegen_flags: <defaults>
</compile_context>

<pallas_src>
import math

import jax
import jax.numpy as jnp
from jax.experimental import pallas as pl
from jax.experimental.pallas import tpu as pltpu


# ------------------------------- utilities -------------------------------- #

def _round_up(v, m):
    return ((v + m - 1) // m) * m


def _vmem_budget_bytes():
    """~80% of this chip's per-core VMEM; conservative 48 MiB if unknown."""
    try:
        info = pltpu.get_tpu_info()
        cap = int(getattr(info, "vmem_capacity_bytes", 0) or 0)
        if cap > 0:
            return int(cap * 0.8)
    except Exception:
        pass
    return 48 << 20


def _pick_row_tile(n, *, tm_max=512, min_steps=4):
    """Row tile: as large as tm_max, but small enough to give >= min_steps grid
    steps (megacore sharding on v7x + DMA/compute overlap)."""
    if n <= 8:
        return n
    tm = max(8, _round_up(pl.cdiv(n, min_steps), 8))
    return min(tm, tm_max, _round_up(n, 8))


# ----------------------------- Pallas kernel ------------------------------ #

def _make_linff_kernel(num_pairs, fuse_glu, f_out):
    """Fused kernel over a group of (Linear, SwiGLU) pairs for one row tile."""
    refs_per_pair = 4 if fuse_glu else 6

    def kernel(x_ref, *refs):
        o_ref = refs[-1]
        w_refs = refs[:-1]
        h = x_ref[...].astype(jnp.float32)
        for p in range(num_pairs):                 # static -> fully unrolled
            base = refs_per_pair * p
            if fuse_glu:
                w1, b1, wglu, bglu = w_refs[base:base + 4]
            else:
                w1, b1, wa, ba, wg, bg = w_refs[base:base + 6]

            # Linear: bf16 operands on the MXU, f32 accumulation, f32 bias.
            hb = h.astype(jnp.bfloat16)
            h = jnp.dot(hb, w1[...], preferred_element_type=jnp.float32) + b1[...]

            hb = h.astype(jnp.bfloat16)
            if fuse_glu:
                # One matmul for the whole projection; the a/gate split is a
                # static lane-aligned slice (f_out % 128 == 0) -> free.
                ag = jnp.dot(hb, wglu[...],
                             preferred_element_type=jnp.float32) + bglu[...]
                a = ag[:, :f_out]
                g = ag[:, f_out:]
            else:
                # Pre-split halves: two lane-aligned matmuls (non-128 widths).
                a = jnp.dot(hb, wa[...], preferred_element_type=jnp.float32) + ba[...]
                g = jnp.dot(hb, wg[...], preferred_element_type=jnp.float32) + bg[...]

            # a * silu(gate): sigmoid on the EUP, mul/adds on the VPU (f32).
            h = a * (g * jax.nn.sigmoid(g))
        o_ref[...] = h.astype(o_ref.dtype)

    return kernel


def _linff_group_call(x, kparams, fuse_glu, out_dtype, tm, single_buffer_weights):
    """One pallas_call over a group of pairs; x is (N, F_in)."""
    n, f_in = x.shape
    f_out = kparams[0][0].shape[1]
    num_pairs = len(kparams)
    grid = pl.cdiv(n, tm)                      # natural partial last block

    const = lambda i: (0, 0)                   # resident blocks
    if single_buffer_weights:
        wspec = lambda shape: pl.BlockSpec(shape, const, pipeline_mode=pl.Buffered(1))
    else:
        wspec = lambda shape: pl.BlockSpec(shape, const)

    in_specs = [pl.BlockSpec((tm, f_in), lambda i: (i, 0))]
    flat_weights = []
    weight_bytes = 0
    for pair in kparams:
        for arr in pair:
            in_specs.append(wspec(arr.shape))
            flat_weights.append(arr)
            weight_bytes += int(arr.size) * arr.dtype.itemsize

    flops = 0
    fin_p = f_in
    for _ in range(num_pairs):
        flops += 2 * n * (fin_p * f_out + 2 * f_out * f_out)
        fin_p = f_out
    out_itemsize = jnp.dtype(out_dtype).itemsize
    act_bytes = n * f_in * x.dtype.itemsize + n * f_out * out_itemsize
    cost = pl.CostEstimate(
        flops=int(flops),
        transcendentals=int(n * f_out * num_pairs),
        bytes_accessed=int(weight_bytes + act_bytes),
    )

    # VMEM accounting: weights x buffer count, double-buffered row tiles,
    # f32 h/a/g intermediates (+ bf16 copies), plus slack for Mosaic scratch.
    wbuf = 1 if single_buffer_weights else 2
    tile_in = tm * f_in * x.dtype.itemsize
    tile_out = tm * f_out * out_itemsize
    interm = 4 * tm * max(f_in, 2 * f_out) * 4
    vmem_need = weight_bytes * wbuf + 2 * (tile_in + tile_out) + interm + (4 << 20)
    vmem_limit = int(min(max(vmem_need, 16 << 20), _vmem_budget_bytes()))

    kernel = _make_linff_kernel(num_pairs, fuse_glu, f_out)
    return pl.pallas_call(
        kernel,
        out_shape=jax.ShapeDtypeStruct((n, f_out), out_dtype),
        grid_spec=pltpu.PrefetchScalarGridSpec(
            num_scalar_prefetch=0,
            grid=(grid,),
            in_specs=in_specs,
            out_specs=pl.BlockSpec((tm, f_out), lambda i: (i, 0)),
        ),
        compiler_params=pltpu.CompilerParams(
            dimension_semantics=("parallel",),
            vmem_limit_bytes=vmem_limit,
        ),
        cost_estimate=cost,
    )(x, *flat_weights)


def _linff_group(x, kparams, fuse_glu, out_dtype, tm):
    try:
        return _linff_group_call(x, kparams, fuse_glu, out_dtype, tm,
                                 single_buffer_weights=True)
    except Exception:
        # Fallback if pl.Buffered(1) on resident blocks is rejected by this
        # jax / libtpu combination: default (double-buffered) specs.
        return _linff_group_call(x, kparams, fuse_glu, out_dtype, tm,
                                 single_buffer_weights=False)


# --------------------------- Parameter handling ---------------------------- #

def init_linff_params(key, in_features, out_features, num_ff, num_experts):
    """Torch-style init, f32 master weights, pre-transposed to (in, out)."""
    num_pairs = 1 + num_experts + max(num_ff - 1, 0)
    params = []
    fin = in_features
    for _ in range(num_pairs):
        key, k1, k2, k3, k4 = jax.random.split(key, 5)
        b1d = 1.0 / math.sqrt(fin)
        w1_t = jax.random.uniform(k1, (fin, out_features), jnp.float32, -b1d, b1d)
        b1 = jax.random.uniform(k2, (1, out_features), jnp.float32, -b1d, b1d)
        b2d = 1.0 / math.sqrt(out_features)
        wglu_t = jax.random.uniform(k3, (out_features, 2 * out_features),
                                    jnp.float32, -b2d, b2d)
        bglu = jax.random.uniform(k4, (1, 2 * out_features), jnp.float32, -b2d, b2d)
        params.append((w1_t, b1, wglu_t, bglu))
        fin = out_features
    return params


def prepare_kernel_params(params, fuse_glu):
    """Kernel layout: bf16 weights, f32 biases; SwiGLU projection pre-split
    into a/gate halves when f_out is not 128-aligned (fuse_glu=False)."""
    kparams = []
    for (w1_t, b1, wglu_t, bglu) in params:
        f_out = w1_t.shape[1]
        w1 = w1_t.astype(jnp.bfloat16)
        if fuse_glu:
            kparams.append((w1, b1, wglu_t.astype(jnp.bfloat16), bglu))
        else:
            wa = wglu_t[:, :f_out].astype(jnp.bfloat16)
            wg = wglu_t[:, f_out:].astype(jnp.bfloat16)
            ba = bglu[:, :f_out]
            bg = bglu[:, f_out:]
            kparams.append((w1, b1, wa, ba, wg, bg))
    return kparams


def _split_groups(kparams, weight_budget):
    """Greedy split of pairs into groups whose resident weights fit VMEM."""
    groups, cur, cur_bytes = [], [], 0
    for pair in kparams:
        pb = sum(int(a.size) * a.dtype.itemsize for a in pair)
        if cur and cur_bytes + pb > weight_budget:
            groups.append(cur)
            cur, cur_bytes = [], 0
        cur.append(pair)
        cur_bytes += pb
    groups.append(cur)
    return groups


# ------------------------------ Forward pass ------------------------------- #

def linff_forward_pallas(x, kparams, fuse_glu, *, tm_max=512):
    """x: (..., in_features) -> (..., out_features)."""
    lead = x.shape[:-1]
    n = math.prod(lead)
    h = x.reshape(n, x.shape[-1])
    out_dtype = x.dtype

    tm = _pick_row_tile(n, tm_max=tm_max)
    groups = _split_groups(kparams, weight_budget=_vmem_budget_bytes() // 2)
    for gi, grp in enumerate(groups):
        # Intermediate group outputs stay bf16 (next group re-casts anyway);
        # the final group writes the caller's dtype.
        g_dtype = out_dtype if gi == len(groups) - 1 else jnp.bfloat16
        h = _linff_group(h, grp, fuse_glu, g_dtype, tm)
    return h.reshape(*lead, h.shape[-1])


def linff_forward_ref(x, params, *, bf16_matmul):
    """Pure-JAX reference.  bf16_matmul=True mirrors the kernel's precision
    (bf16 operands, f32 accumulation); False is the original f32 module math."""
    lead = x.shape[:-1]
    h = x.reshape(-1, x.shape[-1]).astype(jnp.float32)
    for (w1_t, b1, wglu_t, bglu) in params:
        f_out = w1_t.shape[1]
        if bf16_matmul:
            h = jnp.dot(h.astype(jnp.bfloat16), w1_t.astype(jnp.bfloat16),
                        preferred_element_type=jnp.float32) + b1
            ag = jnp.dot(h.astype(jnp.bfloat16), wglu_t.astype(jnp.bfloat16),
                         preferred_element_type=jnp.float32) + bglu
        else:
            h = h @ w1_t + b1
            ag = h @ wglu_t + bglu
        a, g = ag[:, :f_out], ag[:, f_out:]
        h = a * jax.nn.silu(g)
    return h.reshape(*lead, h.shape[-1])


# ----------------------------------- Main ---------------------------------- #

if __name__ == "__main__":
    in_features, out_features = 32, 32
    num_ff, num_experts = 2, 1          # -> 3 (Linear, SwiGLU) pairs total
    batch, seq = 2, 64                  # N = 128 rows -> grid of 4 row tiles

    key = jax.random.PRNGKey(0)
    kx, kp = jax.random.split(key)
    x = jax.random.normal(kx, (batch, seq, in_features), jnp.float32)

    params = init_linff_params(kp, in_features, out_features, num_ff, num_experts)
    fuse_glu = (out_features % 128 == 0)          # demo: False -> pre-split GLU
    kparams = prepare_kernel_params(params, fuse_glu)

    out = linff_forward_pallas(x, kparams, fuse_glu)
    out = jax.block_until_ready(out)

    ref_bf16 = linff_forward_ref(x, params, bf16_matmul=True)   # mirrors kernel math
    ref_f32 = linff_forward_ref(x, params, bf16_matmul=False)   # original f32 module

    assert out.shape == (batch, seq, out_features)
    assert jnp.allclose(out, ref_bf16, atol=5e-3, rtol=1e-2), \
        "mismatch vs bf16-matmul reference"
    assert jnp.allclose(out, ref_f32, atol=8e-2, rtol=8e-2), \
        "mismatch vs f32 reference (beyond bf16 quantization budget)"

    print("KERNEL_OK")
</pallas_src>

<mosaic_0001>
module attributes {stable_mosaic.version = 11 : i64} {
  func.func @kernel(%arg0: i32, %arg1: memref<32x32xf32, #tpu.memory_space<vmem>>, %arg2: memref<32x32xbf16, #tpu.memory_space<vmem>>, %arg3: memref<1x32xf32, #tpu.memory_space<vmem>>, %arg4: memref<32x32xbf16, #tpu.memory_space<vmem>>, %arg5: memref<1x32xf32, #tpu.memory_space<vmem>>, %arg6: memref<32x32xbf16, #tpu.memory_space<vmem>>, %arg7: memref<1x32xf32, #tpu.memory_space<vmem>>, %arg8: memref<32x32xbf16, #tpu.memory_space<vmem>>, %arg9: memref<1x32xf32, #tpu.memory_space<vmem>>, %arg10: memref<32x32xbf16, #tpu.memory_space<vmem>>, %arg11: memref<1x32xf32, #tpu.memory_space<vmem>>, %arg12: memref<32x32xbf16, #tpu.memory_space<vmem>>, %arg13: memref<1x32xf32, #tpu.memory_space<vmem>>, %arg14: memref<32x32xbf16, #tpu.memory_space<vmem>>, %arg15: memref<1x32xf32, #tpu.memory_space<vmem>>, %arg16: memref<32x32xbf16, #tpu.memory_space<vmem>>, %arg17: memref<1x32xf32, #tpu.memory_space<vmem>>, %arg18: memref<32x32xbf16, #tpu.memory_space<vmem>>, %arg19: memref<1x32xf32, #tpu.memory_space<vmem>>, %arg20: memref<32x32xf32, #tpu.memory_space<vmem>>) attributes {dimension_semantics = [#tpu.dimension_semantics<parallel>], iteration_bounds = array<i64: 4>, scalar_prefetch = 0 : i64, scratch_operands = 0 : i64, tpu.core_type = #tpu.core_type<tc>, window_params = [{transform_indices = @transform_0, window_bounds = array<i64: 32, 32>}, {pipeline_mode = #tpu.pipeline_mode<synchronous>, transform_indices = @transform_1, window_bounds = array<i64: 32, 32>}, {pipeline_mode = #tpu.pipeline_mode<synchronous>, transform_indices = @transform_2, window_bounds = array<i64: 1, 32>}, {pipeline_mode = #tpu.pipeline_mode<synchronous>, transform_indices = @transform_3, window_bounds = array<i64: 32, 32>}, {pipeline_mode = #tpu.pipeline_mode<synchronous>, transform_indices = @transform_4, window_bounds = array<i64: 1, 32>}, {pipeline_mode = #tpu.pipeline_mode<synchronous>, transform_indices = @transform_5, window_bounds = array<i64: 32, 32>}, {pipeline_mode = #tpu.pipeline_mode<synchronous>, transform_indices = @transform_6, window_bounds = array<i64: 1, 32>}, {pipeline_mode = #tpu.pipeline_mode<synchronous>, transform_indices = @transform_7, window_bounds = array<i64: 32, 32>}, {pipeline_mode = #tpu.pipeline_mode<synchronous>, transform_indices = @transform_8, window_bounds = array<i64: 1, 32>}, {pipeline_mode = #tpu.pipeline_mode<synchronous>, transform_indices = @transform_9, window_bounds = array<i64: 32, 32>}, {pipeline_mode = #tpu.pipeline_mode<synchronous>, transform_indices = @transform_10, window_bounds = array<i64: 1, 32>}, {pipeline_mode = #tpu.pipeline_mode<synchronous>, transform_indices = @transform_11, window_bounds = array<i64: 32, 32>}, {pipeline_mode = #tpu.pipeline_mode<synchronous>, transform_indices = @transform_12, window_bounds = array<i64: 1, 32>}, {pipeline_mode = #tpu.pipeline_mode<synchronous>, transform_indices = @transform_13, window_bounds = array<i64: 32, 32>}, {pipeline_mode = #tpu.pipeline_mode<synchronous>, transform_indices = @transform_14, window_bounds = array<i64: 1, 32>}, {pipeline_mode = #tpu.pipeline_mode<synchronous>, transform_indices = @transform_15, window_bounds = array<i64: 32, 32>}, {pipeline_mode = #tpu.pipeline_mode<synchronous>, transform_indices = @transform_16, window_bounds = array<i64: 1, 32>}, {pipeline_mode = #tpu.pipeline_mode<synchronous>, transform_indices = @transform_17, window_bounds = array<i64: 32, 32>}, {pipeline_mode = #tpu.pipeline_mode<synchronous>, transform_indices = @transform_18, window_bounds = array<i64: 1, 32>}, {transform_indices = @transform_19, window_bounds = array<i64: 32, 32>}]} {
    %c0 = arith.constant 0 : index
    %c0_0 = arith.constant 0 : index
    %0 = vector.load %arg1[%c0, %c0_0] : memref<32x32xf32, #tpu.memory_space<vmem>>, vector<32x32xf32>
    %1 = arith.truncf %0 : vector<32x32xf32> to vector<32x32xbf16>
    %c0_1 = arith.constant 0 : index
    %c0_2 = arith.constant 0 : index
    %2 = vector.load %arg2[%c0_1, %c0_2] : memref<32x32xbf16, #tpu.memory_space<vmem>>, vector<32x32xbf16>
    %cst = arith.constant dense<0.000000e+00> : vector<32x32xf32>
    %3 = tpu.matmul %1, %2, %cst {dimension_numbers = #tpu.dot_dimension_numbers<[1], [0], [0], [1], [0, 0, 1, 1], [], []>} : vector<32x32xbf16>, vector<32x32xbf16>, vector<32x32xf32> -> vector<32x32xf32>
    %c0_3 = arith.constant 0 : index
    %c0_4 = arith.constant 0 : index
    %4 = vector.load %arg3[%c0_3, %c0_4] : memref<1x32xf32, #tpu.memory_space<vmem>>, vector<1x32xf32>
    %5 = vector.broadcast %4 : vector<1x32xf32> to vector<32x32xf32>
    %6 = arith.addf %3, %5 : vector<32x32xf32>
    %7 = arith.truncf %6 : vector<32x32xf32> to vector<32x32xbf16>
    %c0_5 = arith.constant 0 : index
    %c0_6 = arith.constant 0 : index
    %8 = vector.load %arg4[%c0_5, %c0_6] : memref<32x32xbf16, #tpu.memory_space<vmem>>, vector<32x32xbf16>
    %cst_7 = arith.constant dense<0.000000e+00> : vector<32x32xf32>
    %9 = tpu.matmul %7, %8, %cst_7 {dimension_numbers = #tpu.dot_dimension_numbers<[1], [0], [0], [1], [0, 0, 1, 1], [], []>} : vector<32x32xbf16>, vector<32x32xbf16>, vector<32x32xf32> -> vector<32x32xf32>
    %c0_8 = arith.constant 0 : index
    %c0_9 = arith.constant 0 : index
    %10 = vector.load %arg5[%c0_8, %c0_9] : memref<1x32xf32, #tpu.memory_space<vmem>>, vector<1x32xf32>
    %11 = vector.broadcast %10 : vector<1x32xf32> to vector<32x32xf32>
    %12 = arith.addf %9, %11 : vector<32x32xf32>
    %c0_10 = arith.constant 0 : index
    %c0_11 = arith.constant 0 : index
    %13 = vector.load %arg6[%c0_10, %c0_11] : memref<32x32xbf16, #tpu.memory_space<vmem>>, vector<32x32xbf16>
    %cst_12 = arith.constant dense<0.000000e+00> : vector<32x32xf32>
    %14 = tpu.matmul %7, %13, %cst_12 {dimension_numbers = #tpu.dot_dimension_numbers<[1], [0], [0], [1], [0, 0, 1, 1], [], []>} : vector<32x32xbf16>, vector<32x32xbf16>, vector<32x32xf32> -> vector<32x32xf32>
    %c0_13 = arith.constant 0 : index
    %c0_14 = arith.constant 0 : index
    %15 = vector.load %arg7[%c0_13, %c0_14] : memref<1x32xf32, #tpu.memory_space<vmem>>, vector<1x32xf32>
    %16 = vector.broadcast %15 : vector<1x32xf32> to vector<32x32xf32>
    %17 = arith.addf %14, %16 : vector<32x32xf32>
    %18 = arith.negf %17 : vector<32x32xf32>
    %19 = math.exp %18 : vector<32x32xf32>
    %cst_15 = arith.constant 1.000000e+00 : f32
    %20 = vector.broadcast %cst_15 : f32 to vector<32x32xf32>
    %21 = arith.addf %20, %19 : vector<32x32xf32>
    %22 = arith.divf %20, %21 : vector<32x32xf32>
    %23 = arith.mulf %17, %22 : vector<32x32xf32>
    %24 = arith.mulf %12, %23 : vector<32x32xf32>
    %25 = arith.truncf %24 : vector<32x32xf32> to vector<32x32xbf16>
    %c0_16 = arith.constant 0 : index
    %c0_17 = arith.constant 0 : index
    %26 = vector.load %arg8[%c0_16, %c0_17] : memref<32x32xbf16, #tpu.memory_space<vmem>>, vector<32x32xbf16>
    %cst_18 = arith.constant dense<0.000000e+00> : vector<32x32xf32>
    %27 = tpu.matmul %25, %26, %cst_18 {dimension_numbers = #tpu.dot_dimension_numbers<[1], [0], [0], [1], [0, 0, 1, 1], [], []>} : vector<32x32xbf16>, vector<32x32xbf16>, vector<32x32xf32> -> vector<32x32xf32>
    %c0_19 = arith.constant 0 : index
    %c0_20 = arith.constant 0 : index
    %28 = vector.load %arg9[%c0_19, %c0_20] : memref<1x32xf32, #tpu.memory_space<vmem>>, vector<1x32xf32>
    %29 = vector.broadcast %28 : vector<1x32xf32> to vector<32x32xf32>
    %30 = arith.addf %27, %29 : vector<32x32xf32>
    %31 = arith.truncf %30 : vector<32x32xf32> to vector<32x32xbf16>
    %c0_21 = arith.constant 0 : index
    %c0_22 = arith.constant 0 : index
    %32 = vector.load %arg10[%c0_21, %c0_22] : memref<32x32xbf16, #tpu.memory_space<vmem>>, vector<32x32xbf16>
    %cst_23 = arith.constant dense<0.000000e+00> : vector<32x32xf32>
    %33 = tpu.matmul %31, %32, %cst_23 {dimension_numbers = #tpu.dot_dimension_numbers<[1], [0], [0], [1], [0, 0, 1, 1], [], []>} : vector<32x32xbf16>, vector<32x32xbf16>, vector<32x32xf32> -> vector<32x32xf32>
    %c0_24 = arith.constant 0 : index
    %c0_25 = arith.constant 0 : index
    %34 = vector.load %arg11[%c0_24, %c0_25] : memref<1x32xf32, #tpu.memory_space<vmem>>, vector<1x32xf32>
    %35 = vector.broadcast %34 : vector<1x32xf32> to vector<32x32xf32>
    %36 = arith.addf %33, %35 : vector<32x32xf32>
    %c0_26 = arith.constant 0 : index
    %c0_27 = arith.constant 0 : index
    %37 = vector.load %arg12[%c0_26, %c0_27] : memref<32x32xbf16, #tpu.memory_space<vmem>>, vector<32x32xbf16>
    %cst_28 = arith.constant dense<0.000000e+00> : vector<32x32xf32>
    %38 = tpu.matmul %31, %37, %cst_28 {dimension_numbers = #tpu.dot_dimension_numbers<[1], [0], [0], [1], [0, 0, 1, 1], [], []>} : vector<32x32xbf16>, vector<32x32xbf16>, vector<32x32xf32> -> vector<32x32xf32>
    %c0_29 = arith.constant 0 : index
    %c0_30 = arith.constant 0 : index
    %39 = vector.load %arg13[%c0_29, %c0_30] : memref<1x32xf32, #tpu.memory_space<vmem>>, vector<1x32xf32>
    %40 = vector.broadcast %39 : vector<1x32xf32> to vector<32x32xf32>
    %41 = arith.addf %38, %40 : vector<32x32xf32>
    %42 = arith.negf %41 : vector<32x32xf32>
    %43 = math.exp %42 : vector<32x32xf32>
    %cst_31 = arith.constant 1.000000e+00 : f32
    %44 = vector.broadcast %cst_31 : f32 to vector<32x32xf32>
    %45 = arith.addf %44, %43 : vector<32x32xf32>
    %46 = arith.divf %44, %45 : vector<32x32xf32>
    %47 = arith.mulf %41, %46 : vector<32x32xf32>
    %48 = arith.mulf %36, %47 : vector<32x32xf32>
    %49 = arith.truncf %48 : vector<32x32xf32> to vector<32x32xbf16>
    %c0_32 = arith.constant 0 : index
    %c0_33 = arith.constant 0 : index
    %50 = vector.load %arg14[%c0_32, %c0_33] : memref<32x32xbf16, #tpu.memory_space<vmem>>, vector<32x32xbf16>
    %cst_34 = arith.constant dense<0.000000e+00> : vector<32x32xf32>
    %51 = tpu.matmul %49, %50, %cst_34 {dimension_numbers = #tpu.dot_dimension_numbers<[1], [0], [0], [1], [0, 0, 1, 1], [], []>} : vector<32x32xbf16>, vector<32x32xbf16>, vector<32x32xf32> -> vector<32x32xf32>
    %c0_35 = arith.constant 0 : index
    %c0_36 = arith.constant 0 : index
    %52 = vector.load %arg15[%c0_35, %c0_36] : memref<1x32xf32, #tpu.memory_space<vmem>>, vector<1x32xf32>
    %53 = vector.broadcast %52 : vector<1x32xf32> to vector<32x32xf32>
    %54 = arith.addf %51, %53 : vector<32x32xf32>
    %55 = arith.truncf %54 : vector<32x32xf32> to vector<32x32xbf16>
    %c0_37 = arith.constant 0 : index
    %c0_38 = arith.constant 0 : index
    %56 = vector.load %arg16[%c0_37, %c0_38] : memref<32x32xbf16, #tpu.memory_space<vmem>>, vector<32x32xbf16>
    %cst_39 = arith.constant dense<0.000000e+00> : vector<32x32xf32>
    %57 = tpu.matmul %55, %56, %cst_39 {dimension_numbers = #tpu.dot_dimension_numbers<[1], [0], [0], [1], [0, 0, 1, 1], [], []>} : vector<32x32xbf16>, vector<32x32xbf16>, vector<32x32xf32> -> vector<32x32xf32>
    %c0_40 = arith.constant 0 : index
    %c0_41 = arith.constant 0 : index
    %58 = vector.load %arg17[%c0_40, %c0_41] : memref<1x32xf32, #tpu.memory_space<vmem>>, vector<1x32xf32>
    %59 = vector.broadcast %58 : vector<1x32xf32> to vector<32x32xf32>
    %60 = arith.addf %57, %59 : vector<32x32xf32>
    %c0_42 = arith.constant 0 : index
    %c0_43 = arith.constant 0 : index
    %61 = vector.load %arg18[%c0_42, %c0_43] : memref<32x32xbf16, #tpu.memory_space<vmem>>, vector<32x32xbf16>
    %cst_44 = arith.constant dense<0.000000e+00> : vector<32x32xf32>
    %62 = tpu.matmul %55, %61, %cst_44 {dimension_numbers = #tpu.dot_dimension_numbers<[1], [0], [0], [1], [0, 0, 1, 1], [], []>} : vector<32x32xbf16>, vector<32x32xbf16>, vector<32x32xf32> -> vector<32x32xf32>
    %c0_45 = arith.constant 0 : index
    %c0_46 = arith.constant 0 : index
    %63 = vector.load %arg19[%c0_45, %c0_46] : memref<1x32xf32, #tpu.memory_space<vmem>>, vector<1x32xf32>
    %64 = vector.broadcast %63 : vector<1x32xf32> to vector<32x32xf32>
    %65 = arith.addf %62, %64 : vector<32x32xf32>
    %66 = arith.negf %65 : vector<32x32xf32>
    %67 = math.exp %66 : vector<32x32xf32>
    %cst_47 = arith.constant 1.000000e+00 : f32
    %68 = vector.broadcast %cst_47 : f32 to vector<32x32xf32>
    %69 = arith.addf %68, %67 : vector<32x32xf32>
    %70 = arith.divf %68, %69 : vector<32x32xf32>
    %71 = arith.mulf %65, %70 : vector<32x32xf32>
    %72 = arith.mulf %60, %71 : vector<32x32xf32>
    %c0_48 = arith.constant 0 : index
    %c0_49 = arith.constant 0 : index
    %73 = vector.load %arg20[%c0_48, %c0_49] : memref<32x32xf32, #tpu.memory_space<vmem>>, vector<32x32xf32>
    tpu.vector_store %arg20[%c0_48, %c0_49], %72 {strides = array<i32>} : memref<32x32xf32, #tpu.memory_space<vmem>>, vector<32x32xf32>,
    return
  }
  func.func @transform_0(%arg0: i32) -> (i32, i32) {
    %c0_i32 = arith.constant 0 : i32
    %c0_i32_0 = arith.constant 0 : i32
    return %arg0, %c0_i32 : i32, i32
  }
  func.func @transform_1(%arg0: i32) -> (i32, i32) {
    %c0_i32 = arith.constant 0 : i32
    %c0_i32_0 = arith.constant 0 : i32
    %c0_i32_1 = arith.constant 0 : i32
    return %c0_i32, %c0_i32_0 : i32, i32
  }
  func.func @transform_2(%arg0: i32) -> (i32, i32) {
    %c0_i32 = arith.constant 0 : i32
    %c0_i32_0 = arith.constant 0 : i32
    %c0_i32_1 = arith.constant 0 : i32
    return %c0_i32, %c0_i32_0 : i32, i32
  }
  func.func @transform_3(%arg0: i32) -> (i32, i32) {
    %c0_i32 = arith.constant 0 : i32
    %c0_i32_0 = arith.constant 0 : i32
    %c0_i32_1 = arith.constant 0 : i32
    return %c0_i32, %c0_i32_0 : i32, i32
  }
  func.func @transform_4(%arg0: i32) -> (i32, i32) {
    %c0_i32 = arith.constant 0 : i32
    %c0_i32_0 = arith.constant 0 : i32
    %c0_i32_1 = arith.constant 0 : i32
    return %c0_i32, %c0_i32_0 : i32, i32
  }
  func.func @transform_5(%arg0: i32) -> (i32, i32) {
    %c0_i32 = arith.constant 0 : i32
    %c0_i32_0 = arith.constant 0 : i32
    %c0_i32_1 = arith.constant 0 : i32
    return %c0_i32, %c0_i32_0 : i32, i32
  }
  func.func @transform_6(%arg0: i32) -> (i32, i32) {
    %c0_i32 = arith.constant 0 : i32
    %c0_i32_0 = arith.constant 0 : i32
    %c0_i32_1 = arith.constant 0 : i32
    return %c0_i32, %c0_i32_0 : i32, i32
  }
  func.func @transform_7(%arg0: i32) -> (i32, i32) {
    %c0_i32 = arith.constant 0 : i32
    %c0_i32_0 = arith.constant 0 : i32
    %c0_i32_1 = arith.constant 0 : i32
    return %c0_i32, %c0_i32_0 : i32, i32
  }
  func.func @transform_8(%arg0: i32) -> (i32, i32) {
    %c0_i32 = arith.constant 0 : i32
    %c0_i32_0 = arith.constant 0 : i32
    %c0_i32_1 = arith.constant 0 : i32
    return %c0_i32, %c0_i32_0 : i32, i32
  }
  func.func @transform_9(%arg0: i32) -> (i32, i32) {
    %c0_i32 = arith.constant 0 : i32
    %c0_i32_0 = arith.constant 0 : i32
    %c0_i32_1 = arith.constant 0 : i32
    return %c0_i32, %c0_i32_0 : i32, i32
  }
  func.func @transform_10(%arg0: i32) -> (i32, i32) {
    %c0_i32 = arith.constant 0 : i32
    %c0_i32_0 = arith.constant 0 : i32
    %c0_i32_1 = arith.constant 0 : i32
    return %c0_i32, %c0_i32_0 : i32, i32
  }
  func.func @transform_11(%arg0: i32) -> (i32, i32) {
    %c0_i32 = arith.constant 0 : i32
    %c0_i32_0 = arith.constant 0 : i32
    %c0_i32_1 = arith.constant 0 : i32
    return %c0_i32, %c0_i32_0 : i32, i32
  }
  func.func @transform_12(%arg0: i32) -> (i32, i32) {
    %c0_i32 = arith.constant 0 : i32
    %c0_i32_0 = arith.constant 0 : i32
    %c0_i32_1 = arith.constant 0 : i32
    return %c0_i32, %c0_i32_0 : i32, i32
  }
  func.func @transform_13(%arg0: i32) -> (i32, i32) {
    %c0_i32 = arith.constant 0 : i32
    %c0_i32_0 = arith.constant 0 : i32
    %c0_i32_1 = arith.constant 0 : i32
    return %c0_i32, %c0_i32_0 : i32, i32
  }
  func.func @transform_14(%arg0: i32) -> (i32, i32) {
    %c0_i32 = arith.constant 0 : i32
    %c0_i32_0 = arith.constant 0 : i32
    %c0_i32_1 = arith.constant 0 : i32
    return %c0_i32, %c0_i32_0 : i32, i32
  }
  func.func @transform_15(%arg0: i32) -> (i32, i32) {
    %c0_i32 = arith.constant 0 : i32
    %c0_i32_0 = arith.constant 0 : i32
    %c0_i32_1 = arith.constant 0 : i32
    return %c0_i32, %c0_i32_0 : i32, i32
  }
  func.func @transform_16(%arg0: i32) -> (i32, i32) {
    %c0_i32 = arith.constant 0 : i32
    %c0_i32_0 = arith.constant 0 : i32
    %c0_i32_1 = arith.constant 0 : i32
    return %c0_i32, %c0_i32_0 : i32, i32
  }
  func.func @transform_17(%arg0: i32) -> (i32, i32) {
    %c0_i32 = arith.constant 0 : i32
    %c0_i32_0 = arith.constant 0 : i32
    %c0_i32_1 = arith.constant 0 : i32
    return %c0_i32, %c0_i32_0 : i32, i32
  }
  func.func @transform_18(%arg0: i32) -> (i32, i32) {
    %c0_i32 = arith.constant 0 : i32
    %c0_i32_0 = arith.constant 0 : i32
    %c0_i32_1 = arith.constant 0 : i32
    return %c0_i32, %c0_i32_0 : i32, i32
  }
  func.func @transform_19(%arg0: i32) -> (i32, i32) {
    %c0_i32 = arith.constant 0 : i32
    %c0_i32_0 = arith.constant 0 : i32
    return %arg0, %c0_i32 : i32, i32
  }
}

module attributes {stable_mosaic.version = 11 : i64} {
  func.func @kernel(%arg0: i32, %arg1: memref<32x32xf32, #tpu.memory_space<vmem>>, %arg2: memref<32x32xbf16, #tpu.memory_space<vmem>>, %arg3: memref<1x32xf32, #tpu.memory_space<vmem>>, %arg4: memref<32x32xbf16, #tpu.memory_space<vmem>>, %arg5: memref<1x32xf32, #tpu.memory_space<vmem>>, %arg6: memref<32x32xbf16, #tpu.memory_space<vmem>>, %arg7: memref<1x32xf32, #tpu.memory_space<vmem>>, %arg8: memref<32x32xbf16, #tpu.memory_space<vmem>>, %arg9: memref<1x32xf32, #tpu.memory_space<vmem>>, %arg10: memref<32x32xbf16, #tpu.memory_space<vmem>>, %arg11: memref<1x32xf32, #tpu.memory_space<vmem>>, %arg12: memref<32x32xbf16, #tpu.memory_space<vmem>>, %arg13: memref<1x32xf32, #tpu.memory_space<vmem>>, %arg14: memref<32x32xbf16, #tpu.memory_space<vmem>>, %arg15: memref<1x32xf32, #tpu.memory_space<vmem>>, %arg16: memref<32x32xbf16, #tpu.memory_space<vmem>>, %arg17: memref<1x32xf32, #tpu.memory_space<vmem>>, %arg18: memref<32x32xbf16, #tpu.memory_space<vmem>>, %arg19: memref<1x32xf32, #tpu.memory_space<vmem>>, %arg20: memref<32x32xf32, #tpu.memory_space<vmem>>) attributes {dimension_semantics = [#tpu.dimension_semantics<parallel>], iteration_bounds = array<i64: 4>, scalar_prefetch = 0 : i64, scratch_operands = 0 : i64, tpu.core_type = #tpu.core_type<tc>, window_params = [{transform_indices = @transform_0, window_bounds = array<i64: 32, 32>}, {pipeline_mode = #tpu.pipeline_mode<synchronous>, transform_indices = @transform_1, window_bounds = array<i64: 32, 32>}, {pipeline_mode = #tpu.pipeline_mode<synchronous>, transform_indices = @transform_2, window_bounds = array<i64: 1, 32>}, {pipeline_mode = #tpu.pipeline_mode<synchronous>, transform_indices = @transform_3, window_bounds = array<i64: 32, 32>}, {pipeline_mode = #tpu.pipeline_mode<synchronous>, transform_indices = @transform_4, window_bounds = array<i64: 1, 32>}, {pipeline_mode = #tpu.pipeline_mode<synchronous>, transform_indices = @transform_5, window_bounds = array<i64: 32, 32>}, {pipeline_mode = #tpu.pipeline_mode<synchronous>, transform_indices = @transform_6, window_bounds = array<i64: 1, 32>}, {pipeline_mode = #tpu.pipeline_mode<synchronous>, transform_indices = @transform_7, window_bounds = array<i64: 32, 32>}, {pipeline_mode = #tpu.pipeline_mode<synchronous>, transform_indices = @transform_8, window_bounds = array<i64: 1, 32>}, {pipeline_mode = #tpu.pipeline_mode<synchronous>, transform_indices = @transform_9, window_bounds = array<i64: 32, 32>}, {pipeline_mode = #tpu.pipeline_mode<synchronous>, transform_indices = @transform_10, window_bounds = array<i64: 1, 32>}, {pipeline_mode = #tpu.pipeline_mode<synchronous>, transform_indices = @transform_11, window_bounds = array<i64: 32, 32>}, {pipeline_mode = #tpu.pipeline_mode<synchronous>, transform_indices = @transform_12, window_bounds = array<i64: 1, 32>}, {pipeline_mode = #tpu.pipeline_mode<synchronous>, transform_indices = @transform_13, window_bounds = array<i64: 32, 32>}, {pipeline_mode = #tpu.pipeline_mode<synchronous>, transform_indices = @transform_14, window_bounds = array<i64: 1, 32>}, {pipeline_mode = #tpu.pipeline_mode<synchronous>, transform_indices = @transform_15, window_bounds = array<i64: 32, 32>}, {pipeline_mode = #tpu.pipeline_mode<synchronous>, transform_indices = @transform_16, window_bounds = array<i64: 1, 32>}, {pipeline_mode = #tpu.pipeline_mode<synchronous>, transform_indices = @transform_17, window_bounds = array<i64: 32, 32>}, {pipeline_mode = #tpu.pipeline_mode<synchronous>, transform_indices = @transform_18, window_bounds = array<i64: 1, 32>}, {transform_indices = @transform_19, window_bounds = array<i64: 32, 32>}]} {
    %c0 = arith.constant 0 : index
    %c0_0 = arith.constant 0 : index
    %0 = vector.load %arg1[%c0, %c0_0] : memref<32x32xf32, #tpu.memory_space<vmem>>, vector<32x32xf32>
    %1 = arith.truncf %0 : vector<32x32xf32> to vector<32x32xbf16>
    %c0_1 = arith.constant 0 : index
    %c0_2 = arith.constant 0 : index
    %2 = vector.load %arg2[%c0_1, %c0_2] : memref<32x32xbf16, #tpu.memory_space<vmem>>, vector<32x32xbf16>
    %cst = arith.constant dense<0.000000e+00> : vector<32x32xf32>
    %3 = tpu.matmul %1, %2, %cst {dimension_numbers = #tpu.dot_dimension_numbers<[1], [0], [0], [1], [0, 0, 1, 1], [], []>} : vector<32x32xbf16>, vector<32x32xbf16>, vector<32x32xf32> -> vector<32x32xf32>
    %c0_3 = arith.constant 0 : index
    %c0_4 = arith.constant 0 : index
    %4 = vector.load %arg3[%c0_3, %c0_4] : memref<1x32xf32, #tpu.memory_space<vmem>>, vector<1x32xf32>
    %5 = vector.broadcast %4 : vector<1x32xf32> to vector<32x32xf32>
    %6 = arith.addf %3, %5 : vector<32x32xf32>
    %7 = arith.truncf %6 : vector<32x32xf32> to vector<32x32xbf16>
    %c0_5 = arith.constant 0 : index
    %c0_6 = arith.constant 0 : index
    %8 = vector.load %arg4[%c0_5, %c0_6] : memref<32x32xbf16, #tpu.memory_space<vmem>>, vector<32x32xbf16>
    %cst_7 = arith.constant dense<0.000000e+00> : vector<32x32xf32>
    %9 = tpu.matmul %7, %8, %cst_7 {dimension_numbers = #tpu.dot_dimension_numbers<[1], [0], [0], [1], [0, 0, 1, 1], [], []>} : vector<32x32xbf16>, vector<32x32xbf16>, vector<32x32xf32> -> vector<32x32xf32>
    %c0_8 = arith.constant 0 : index
    %c0_9 = arith.constant 0 : index
    %10 = vector.load %arg5[%c0_8, %c0_9] : memref<1x32xf32, #tpu.memory_space<vmem>>, vector<1x32xf32>
    %11 = vector.broadcast %10 : vector<1x32xf32> to vector<32x32xf32>
    %12 = arith.addf %9, %11 : vector<32x32xf32>
    %c0_10 = arith.constant 0 : index
    %c0_11 = arith.constant 0 : index
    %13 = vector.load %arg6[%c0_10, %c0_11] : memref<32x32xbf16, #tpu.memory_space<vmem>>, vector<32x32xbf16>
    %cst_12 = arith.constant dense<0.000000e+00> : vector<32x32xf32>
    %14 = tpu.matmul %7, %13, %cst_12 {dimension_numbers = #tpu.dot_dimension_numbers<[1], [0], [0], [1], [0, 0, 1, 1], [], []>} : vector<32x32xbf16>, vector<32x32xbf16>, vector<32x32xf32> -> vector<32x32xf32>
    %c0_13 = arith.constant 0 : index
    %c0_14 = arith.constant 0 : index
    %15 = vector.load %arg7[%c0_13, %c0_14] : memref<1x32xf32, #tpu.memory_space<vmem>>, vector<1x32xf32>
    %16 = vector.broadcast %15 : vector<1x32xf32> to vector<32x32xf32>
    %17 = arith.addf %14, %16 : vector<32x32xf32>
    %18 = arith.negf %17 : vector<32x32xf32>
    %19 = math.exp %18 : vector<32x32xf32>
    %cst_15 = arith.constant 1.000000e+00 : f32
    %20 = vector.broadcast %cst_15 : f32 to vector<32x32xf32>
    %21 = arith.addf %20, %19 : vector<32x32xf32>
    %22 = arith.divf %20, %21 : vector<32x32xf32>
    %23 = arith.mulf %17, %22 : vector<32x32xf32>
    %24 = arith.mulf %12, %23 : vector<32x32xf32>
    %25 = arith.truncf %24 : vector<32x32xf32> to vector<32x32xbf16>
    %c0_16 = arith.constant 0 : index
    %c0_17 = arith.constant 0 : index
    %26 = vector.load %arg8[%c0_16, %c0_17] : memref<32x32xbf16, #tpu.memory_space<vmem>>, vector<32x32xbf16>
    %cst_18 = arith.constant dense<0.000000e+00> : vector<32x32xf32>
    %27 = tpu.matmul %25, %26, %cst_18 {dimension_numbers = #tpu.dot_dimension_numbers<[1], [0], [0], [1], [0, 0, 1, 1], [], []>} : vector<32x32xbf16>, vector<32x32xbf16>, vector<32x32xf32> -> vector<32x32xf32>
    %c0_19 = arith.constant 0 : index
    %c0_20 = arith.constant 0 : index
    %28 = vector.load %arg9[%c0_19, %c0_20] : memref<1x32xf32, #tpu.memory_space<vmem>>, vector<1x32xf32>
    %29 = vector.broadcast %28 : vector<1x32xf32> to vector<32x32xf32>
    %30 = arith.addf %27, %29 : vector<32x32xf32>
    %31 = arith.truncf %30 : vector<32x32xf32> to vector<32x32xbf16>
    %c0_21 = arith.constant 0 : index
    %c0_22 = arith.constant 0 : index
    %32 = vector.load %arg10[%c0_21, %c0_22] : memref<32x32xbf16, #tpu.memory_space<vmem>>, vector<32x32xbf16>
    %cst_23 = arith.constant dense<0.000000e+00> : vector<32x32xf32>
    %33 = tpu.matmul %31, %32, %cst_23 {dimension_numbers = #tpu.dot_dimension_numbers<[1], [0], [0], [1], [0, 0, 1, 1], [], []>} : vector<32x32xbf16>, vector<32x32xbf16>, vector<32x32xf32> -> vector<32x32xf32>
    %c0_24 = arith.constant 0 : index
    %c0_25 = arith.constant 0 : index
    %34 = vector.load %arg11[%c0_24, %c0_25] : memref<1x32xf32, #tpu.memory_space<vmem>>, vector<1x32xf32>
    %35 = vector.broadcast %34 : vector<1x32xf32> to vector<32x32xf32>
    %36 = arith.addf %33, %35 : vector<32x32xf32>
    %c0_26 = arith.constant 0 : index
    %c0_27 = arith.constant 0 : index
    %37 = vector.load %arg12[%c0_26, %c0_27] : memref<32x32xbf16, #tpu.memory_space<vmem>>, vector<32x32xbf16>
    %cst_28 = arith.constant dense<0.000000e+00> : vector<32x32xf32>
    %38 = tpu.matmul %31, %37, %cst_28 {dimension_numbers = #tpu.dot_dimension_numbers<[1], [0], [0], [1], [0, 0, 1, 1], [], []>} : vector<32x32xbf16>, vector<32x32xbf16>, vector<32x32xf32> -> vector<32x32xf32>
    %c0_29 = arith.constant 0 : index
    %c0_30 = arith.constant 0 : index
    %39 = vector.load %arg13[%c0_29, %c0_30] : memref<1x32xf32, #tpu.memory_space<vmem>>, vector<1x32xf32>
    %40 = vector.broadcast %39 : vector<1x32xf32> to vector<32x32xf32>
    %41 = arith.addf %38, %40 : vector<32x32xf32>
    %42 = arith.negf %41 : vector<32x32xf32>
    %43 = math.exp %42 : vector<32x32xf32>
    %cst_31 = arith.constant 1.000000e+00 : f32
    %44 = vector.broadcast %cst_31 : f32 to vector<32x32xf32>
    %45 = arith.addf %44, %43 : vector<32x32xf32>
    %46 = arith.divf %44, %45 : vector<32x32xf32>
    %47 = arith.mulf %41, %46 : vector<32x32xf32>
    %48 = arith.mulf %36, %47 : vector<32x32xf32>
    %49 = arith.truncf %48 : vector<32x32xf32> to vector<32x32xbf16>
    %c0_32 = arith.constant 0 : index
    %c0_33 = arith.constant 0 : index
    %50 = vector.load %arg14[%c0_32, %c0_33] : memref<32x32xbf16, #tpu.memory_space<vmem>>, vector<32x32xbf16>
    %cst_34 = arith.constant dense<0.000000e+00> : vector<32x32xf32>
    %51 = tpu.matmul %49, %50, %cst_34 {dimension_numbers = #tpu.dot_dimension_numbers<[1], [0], [0], [1], [0, 0, 1, 1], [], []>} : vector<32x32xbf16>, vector<32x32xbf16>, vector<32x32xf32> -> vector<32x32xf32>
    %c0_35 = arith.constant 0 : index
    %c0_36 = arith.constant 0 : index
    %52 = vector.load %arg15[%c0_35, %c0_36] : memref<1x32xf32, #tpu.memory_space<vmem>>, vector<1x32xf32>
    %53 = vector.broadcast %52 : vector<1x32xf32> to vector<32x32xf32>
    %54 = arith.addf %51, %53 : vector<32x32xf32>
    %55 = arith.truncf %54 : vector<32x32xf32> to vector<32x32xbf16>
    %c0_37 = arith.constant 0 : index
    %c0_38 = arith.constant 0 : index
    %56 = vector.load %arg16[%c0_37, %c0_38] : memref<32x32xbf16, #tpu.memory_space<vmem>>, vector<32x32xbf16>
    %cst_39 = arith.constant dense<0.000000e+00> : vector<32x32xf32>
    %57 = tpu.matmul %55, %56, %cst_39 {dimension_numbers = #tpu.dot_dimension_numbers<[1], [0], [0], [1], [0, 0, 1, 1], [], []>} : vector<32x32xbf16>, vector<32x32xbf16>, vector<32x32xf32> -> vector<32x32xf32>
    %c0_40 = arith.constant 0 : index
    %c0_41 = arith.constant 0 : index
    %58 = vector.load %arg17[%c0_40, %c0_41] : memref<1x32xf32, #tpu.memory_space<vmem>>, vector<1x32xf32>
    %59 = vector.broadcast %58 : vector<1x32xf32> to vector<32x32xf32>
    %60 = arith.addf %57, %59 : vector<32x32xf32>
    %c0_42 = arith.constant 0 : index
    %c0_43 = arith.constant 0 : index
    %61 = vector.load %arg18[%c0_42, %c0_43] : memref<32x32xbf16, #tpu.memory_space<vmem>>, vector<32x32xbf16>
    %cst_44 = arith.constant dense<0.000000e+00> : vector<32x32xf32>
    %62 = tpu.matmul %55, %61, %cst_44 {dimension_numbers = #tpu.dot_dimension_numbers<[1], [0], [0], [1], [0, 0, 1, 1], [], []>} : vector<32x32xbf16>, vector<32x32xbf16>, vector<32x32xf32> -> vector<32x32xf32>
    %c0_45 = arith.constant 0 : index
    %c0_46 = arith.constant 0 : index
    %63 = vector.load %arg19[%c0_45, %c0_46] : memref<1x32xf32, #tpu.memory_space<vmem>>, vector<1x32xf32>
    %64 = vector.broadcast %63 : vector<1x32xf32> to vector<32x32xf32>
    %65 = arith.addf %62, %64 : vector<32x32xf32>
    %66 = arith.negf %65 : vector<32x32xf32>
    %67 = math.exp %66 : vector<32x32xf32>
    %cst_47 = arith.constant 1.000000e+00 : f32
    %68 = vector.broadcast %cst_47 : f32 to vector<32x32xf32>
    %69 = arith.addf %68, %67 : vector<32x32xf32>
    %70 = arith.divf %68, %69 : vector<32x32xf32>
    %71 = arith.mulf %65, %70 : vector<32x32xf32>
    %72 = arith.mulf %60, %71 : vector<32x32xf32>
    %c0_48 = arith.constant 0 : index
    %c0_49 = arith.constant 0 : index
    %73 = vector.load %arg20[%c0_48, %c0_49] : memref<32x32xf32, #tpu.memory_space<vmem>>, vector<32x32xf32>
    tpu.vector_store %arg20[%c0_48, %c0_49], %72 {strides = array<i32>} : memref<32x32xf32, #tpu.memory_space<vmem>>, vector<32x32xf32>,
    return
  }
  func.func @transform_0(%arg0: i32) -> (i32, i32) {
    %c0_i32 = arith.constant 0 : i32
    %c0_i32_0 = arith.constant 0 : i32
    return %arg0, %c0_i32 : i32, i32
  }
  func.func @transform_1(%arg0: i32) -> (i32, i32) {
    %c0_i32 = arith.constant 0 : i32
    %c0_i32_0 = arith.constant 0 : i32
    %c0_i32_1 = arith.constant 0 : i32
    return %c0_i32, %c0_i32_0 : i32, i32
  }
  func.func @transform_2(%arg0: i32) -> (i32, i32) {
    %c0_i32 = arith.constant 0 : i32
    %c0_i32_0 = arith.constant 0 : i32
    %c0_i32_1 = arith.constant 0 : i32
    return %c0_i32, %c0_i32_0 : i32, i32
  }
  func.func @transform_3(%arg0: i32) -> (i32, i32) {
    %c0_i32 = arith.constant 0 : i32
    %c0_i32_0 = arith.constant 0 : i32
    %c0_i32_1 = arith.constant 0 : i32
    return %c0_i32, %c0_i32_0 : i32, i32
  }
  func.func @transform_4(%arg0: i32) -> (i32, i32) {
    %c0_i32 = arith.constant 0 : i32
    %c0_i32_0 = arith.constant 0 : i32
    %c0_i32_1 = arith.constant 0 : i32
    return %c0_i32, %c0_i32_0 : i32, i32
  }
  func.func @transform_5(%arg0: i32) -> (i32, i32) {
    %c0_i32 = arith.constant 0 : i32
    %c0_i32_0 = arith.constant 0 : i32
    %c0_i32_1 = arith.constant 0 : i32
    return %c0_i32, %c0_i32_0 : i32, i32
  }
  func.func @transform_6(%arg0: i32) -> (i32, i32) {
    %c0_i32 = arith.constant 0 : i32
    %c0_i32_0 = arith.constant 0 : i32
    %c0_i32_1 = arith.constant 0 : i32
    return %c0_i32, %c0_i32_0 : i32, i32
  }
  func.func @transform_7(%arg0: i32) -> (i32, i32) {
    %c0_i32 = arith.constant 0 : i32
    %c0_i32_0 = arith.constant 0 : i32
    %c0_i32_1 = arith.constant 0 : i32
    return %c0_i32, %c0_i32_0 : i32, i32
  }
  func.func @transform_8(%arg0: i32) -> (i32, i32) {
    %c0_i32 = arith.constant 0 : i32
    %c0_i32_0 = arith.constant 0 : i32
    %c0_i32_1 = arith.constant 0 : i32
    return %c0_i32, %c0_i32_0 : i32, i32
  }
  func.func @transform_9(%arg0: i32) -> (i32, i32) {
    %c0_i32 = arith.constant 0 : i32
    %c0_i32_0 = arith.constant 0 : i32
    %c0_i32_1 = arith.constant 0 : i32
    return %c0_i32, %c0_i32_0 : i32, i32
  }
  func.func @transform_10(%arg0: i32) -> (i32, i32) {
    %c0_i32 = arith.constant 0 : i32
    %c0_i32_0 = arith.constant 0 : i32
    %c0_i32_1 = arith.constant 0 : i32
    return %c0_i32, %c0_i32_0 : i32, i32
  }
  func.func @transform_11(%arg0: i32) -> (i32, i32) {
    %c0_i32 = arith.constant 0 : i32
    %c0_i32_0 = arith.constant 0 : i32
    %c0_i32_1 = arith.constant 0 : i32
    return %c0_i32, %c0_i32_0 : i32, i32
  }
  func.func @transform_12(%arg0: i32) -> (i32, i32) {
    %c0_i32 = arith.constant 0 : i32
    %c0_i32_0 = arith.constant 0 : i32
    %c0_i32_1 = arith.constant 0 : i32
    return %c0_i32, %c0_i32_0 : i32, i32
  }
  func.func @transform_13(%arg0: i32) -> (i32, i32) {
    %c0_i32 = arith.constant 0 : i32
    %c0_i32_0 = arith.constant 0 : i32
    %c0_i32_1 = arith.constant 0 : i32
    return %c0_i32, %c0_i32_0 : i32, i32
  }
  func.func @transform_14(%arg0: i32) -> (i32, i32) {
    %c0_i32 = arith.constant 0 : i32
    %c0_i32_0 = arith.constant 0 : i32
    %c0_i32_1 = arith.constant 0 : i32
    return %c0_i32, %c0_i32_0 : i32, i32
  }
  func.func @transform_15(%arg0: i32) -> (i32, i32) {
    %c0_i32 = arith.constant 0 : i32
    %c0_i32_0 = arith.constant 0 : i32
    %c0_i32_1 = arith.constant 0 : i32
    return %c0_i32, %c0_i32_0 : i32, i32
  }
  func.func @transform_16(%arg0: i32) -> (i32, i32) {
    %c0_i32 = arith.constant 0 : i32
    %c0_i32_0 = arith.constant 0 : i32
    %c0_i32_1 = arith.constant 0 : i32
    return %c0_i32, %c0_i32_0 : i32, i32
  }
  func.func @transform_17(%arg0: i32) -> (i32, i32) {
    %c0_i32 = arith.constant 0 : i32
    %c0_i32_0 = arith.constant 0 : i32
    %c0_i32_1 = arith.constant 0 : i32
    return %c0_i32, %c0_i32_0 : i32, i32
  }
  func.func @transform_18(%arg0: i32) -> (i32, i32) {
    %c0_i32 = arith.constant 0 : i32
    %c0_i32_0 = arith.constant 0 : i32
    %c0_i32_1 = arith.constant 0 : i32
    return %c0_i32, %c0_i32_0 : i32, i32
  }
  func.func @transform_19(%arg0: i32) -> (i32, i32) {
    %c0_i32 = arith.constant 0 : i32
    %c0_i32_0 = arith.constant 0 : i32
    return %arg0, %c0_i32 : i32, i32
  }
}

</mosaic_0001>

<bundles_post_ra>
// kernel: tpu_custom_call.1
= control target key start
LH: loop header
LB: loop body
LE: loop exit
PB: predicated region body
PF: predicated region fallthrough
CT: control target
= control target key end

     0   :  { %s1949_s0 = inlined_call_operand.vmem [shape: f32[128,32], index: 0, kind: input, shape index: {}]   ;;  %s1950_s1 = inlined_call_operand.vmem [shape: bf16[32,32], index: 1, kind: input, shape index: {}]   ;;  %s1951_s2 = inlined_call_operand.vmem [shape: f32[1,32], index: 2, kind: input, shape index: {}]   ;;  %s1952_s3 = inlined_call_operand.vmem [shape: bf16[32,32], index: 3, kind: input, shape index: {}]   ;;  %s1953_s4 = inlined_call_operand.vmem [shape: f32[1,32], index: 4, kind: input, shape index: {}]   ;;  %s1954_s5 = inlined_call_operand.vmem [shape: bf16[32,32], index: 5, kind: input, shape index: {}]   ;;  %s1955_s6 = inlined_call_operand.vmem [shape: f32[1,32], index: 6, kind: input, shape index: {}]   ;;  %s1956_s7 = inlined_call_operand.vmem [shape: bf16[32,32], index: 7, kind: input, shape index: {}]   ;;  %s1957_s8 = inlined_call_operand.vmem [shape: f32[1,32], index: 8, kind: input, shape index: {}]   ;;  %s1958_s9 = inlined_call_operand.vmem [shape: bf16[32,32], index: 9, kind: input, shape index: {}]   ;;  %s1959_s10 = inlined_call_operand.vmem [shape: f32[1,32], index: 10, kind: input, shape index: {}]   ;;  %s1960_s11 = inlined_call_operand.vmem [shape: bf16[32,32], index: 11, kind: input, shape index: {}]   ;;  %s1961_s12 = inlined_call_operand.vmem [shape: f32[1,32], index: 12, kind: input, shape index: {}]   ;;  %s1962_s13 = inlined_call_operand.vmem [shape: bf16[32,32], index: 13, kind: input, shape index: {}]   ;;  %s1963_s14 = inlined_call_operand.vmem [shape: f32[1,32], index: 14, kind: input, shape index: {}]   ;;  %s1964_s15 = inlined_call_operand.vmem [shape: bf16[32,32], index: 15, kind: input, shape index: {}]   ;;  %s1965_s16 = inlined_call_operand.vmem [shape: f32[1,32], index: 16, kind: input, shape index: {}]   ;;  %s1966_s17 = inlined_call_operand.vmem [shape: bf16[32,32], index: 17, kind: input, shape index: {}]   ;;  %s1967_s18 = inlined_call_operand.vmem [shape: f32[1,32], index: 18, kind: input, shape index: {}]   ;;  %s1968_s19 = inlined_call_operand.vmem [shape: f32[128,32], index: 19, kind: output, shape index: {}]  }
   0x1   :  { %1971 = sst [smem:[#allocation2_spill]] %s1949_s0  ;;  %s1822_s0 = smov 0  }
   0x2   :  { %1972 = sst [smem:[#allocation3_spill]] %s1950_s1 }
   0x3   :  { %1973 = sst [smem:[#allocation4_spill]] %s1951_s2 }
   0x4   :  { %1974 = sst [smem:[#allocation5_spill]] %s1952_s3 }
   0x5 LB: > { %s1464_s30 = sadd.s32 4294967295, %s1720_s0   ;;  %p1468_p0 = scmp.ge.s32.totalorder %s1720_s0, 1  ;;  %s1720_s0 = sphi %s1822_s0, %s29_s0  }
   0x6   : > { %p538_p1 = scmp.lt.s32.totalorder %s1720_s0, 5 }
   0x8   : > { %p539_p2 = pnand %p1468_p0, %p538_p1 }
   0x9   : > { %s1975_s1 = sld [smem:[#allocation3_spill]] (!%p539_p2)  ;;  %s1469_s22 = sshll.u32 (!%p539_p2), %s1464_s30, 2 }
   0xa   : > { %542 = sbr.rel (%p539_p2) target bundleno = 1354 (0x54a), region = 96  ;;  %p595_p3 = scmp.lt.s32.totalorder (!%p539_p2), %s1469_s22, 15 }
   0xb   : > { %s1976_s26 = sld [smem:[#allocation2_spill]] (!%p539_p2) }
   0xc   : > { %s1977_s21 = sld [smem:[#allocation5_spill]] (!%p539_p2) }
   0xd   : > { %s1978_s28 = sld [smem:[#allocation4_spill]] (!%p539_p2) }
   0xf   : > { %v1648_v0 = vld [vmem:[%s1975_s1 + $0x8] sm:$0xff]   ;;  %v1649_v1 = vld [vmem:[%s1975_s1] sm:$0xff]   ;;  %s1980_s22 = smov (!%p595_p3, %s1469_s22), 15  ;;  %vm636_vm0 = vcmask 261120  }
  0x10   : > { %1568 = vmatprep.subr.bf16.mxu0 %v1648_v0  ;;  %s1470_s24 = sshll.u32 %s1980_s22, 3  ;;  %v1650_v8 = vld [vmem:[%s1954_s5 + $0x8] sm:$0xff]   ;;  %v1652_v10 = vld [vmem:[%s1954_s5] sm:$0xff]  }
  0x11   : > { %1569 = vmatpush3.bf16.msra.mxu0 %v1648_v0  ;;  %s598_s27 = scalar_lea.vmem %s1976_s26, %s1470_s24  ;;  %v1654_v23 = vld [vmem:[%s1956_s7 + $0x8] sm:$0xff]   ;;  %v1655_v24 = vld [vmem:[%s1956_s7] sm:$0xff]   ;;  %s604_s20 = scalar_lea.vmem %s1968_s19, %s1470_s24 }
  0x12   : > { %1570 = vmatprep.subr.bf16.mxu0 %v1649_v1  ;;  %v607_v2 = vld [vmem:[%s598_s27] sm:$0xff]  ;;  %v608_v3 = vld [vmem:[%s598_s27 + $0x8] sm:$0xff]  ;;  %v609_v4 = vld [vmem:[%s598_s27 + $0x10] sm:$0xff] }
  0x13   : > { %v611_v5 = vpack.c.bf16 %v608_v3, %v607_v2  ;;  %v610_v6 = vld [vmem:[%s598_s27 + $0x18] sm:$0xff]  ;;  %v1651_v9 = vld [vmem:[%s1977_s21 + $0x8] sm:$0xff]   ;;  %v1653_v11 = vld [vmem:[%s1977_s21] sm:$0xff]  }
  0x14   : > { %v612_v7 = vpack.c.bf16 %v610_v6, %v609_v4  ;;  %1576 = vmatprep.subr.bf16.mxu1 %v1651_v9  ;;  %v1473_v15 = vld [vmem:[%s1978_s28] ss:$0 sm:$0xff]  ;;  %v1657_v6 = vld [vmem:[%s1958_s9 + $0x8] sm:$0xff]  }
  0x15   : > { %1571 = vmatpush3.bf16.msra.mxu0 %v1649_v1  ;;  %1572 = vmatprep.mubr.msk.bf16.mxu0 %vm636_vm0, %v611_v5  ;;  %v1483_v25 = vld [vmem:[%s1955_s6] ss:$0 sm:$0xff]  ;;  %v1656_v5 = vld [vmem:[%s1960_s11 + $0x8] sm:$0xff]  }
  0x16   : > { %1584 = vmatprep.subr.bf16.mxu0 %v1650_v8  ;;  %1577 = vmatpush3.bf16.msra.mxu1 %v1651_v9  ;;  %v1478_v53 = vld [vmem:[%s1953_s4] ss:$0 sm:$0xff] }
  0x17   : > { %1578 = vmatprep.subr.bf16.mxu1 %v1653_v11 }
  0x18   : > { %1573 = vmatmul.mubr.msk.bf16.vlgmr.msra.gmra.mxu0 %vm636_vm0, %v612_v7  ;;  %v1658_v7 = vld [vmem:[%s1960_s11] sm:$0xff]  }
  0x19   : > { %1585 = vmatpush3.bf16.msra.mxu0 %v1650_v8  ;;  %v1659_v8 = vld [vmem:[%s1958_s9] sm:$0xff]  }
  0x1a   : > { %1586 = vmatprep.subr.bf16.mxu0 %v1652_v10  ;;  %1579 = vmatpush3.bf16.msra.mxu1 %v1653_v11 }
  0x1b   : > { %1592 = vmatprep.subr.bf16.mxu1 %v1654_v23 }
  0x1d   : > { %1587 = vmatpush3.bf16.msra.mxu0 %v1652_v10 }
  0x1e   : > { %1600 = vmatprep.subr.bf16.mxu0 %v1657_v6 }
  0xd8   : > { %v1574_v12 = vpop.f32.mrf.mxu0 }
  0xd9   : > { %v686_v20 = vadd.f32 %v1574_v12, %v1473_v15  ;;  %v1492_v12 = vld [vmem:[%s1957_s8] ss:$0 sm:$0xff] }
  0xda   : > { %v677_v13 = vpop.f32.mrf.mxu0 }
  0xdb   : > { %v678_v18 = vadd.f32 %v1473_v15, %v677_v13 }
  0xdc   : > { %v1575_v14 = vpop.f32.mrf.mxu0 }
  0xdd   : > { %v689_v16 = vadd.f32 %v1575_v14, %v1473_v15 }
  0xde   : > { %v680_v17 = vpop.f32.mrf.mxu0 }
  0xdf   : > { %v681_v19 = vadd.f32 %v1473_v15, %v680_v17  ;;  %v693_v22 = vpack.c.bf16 %v689_v16, %v686_v20  ;;  %v1660_v20 = vld [vmem:[%s1962_s13 + $0x8] sm:$0xff]  }
  0xe1   : > { %v692_v21 = vpack.c.bf16 %v681_v19, %v678_v18 }
  0xe3   : > { %1580 = vmatprep.mubr.msk.bf16.mxu1 %vm636_vm0, %v692_v21  ;;  %1588 = vmatprep.mubr.msk.bf16.mxu0 %vm636_vm0, %v692_v21  ;;  %v1661_v21 = vld [vmem:[%s1962_s13] sm:$0xff]  }
  0xe4   : > { %1581 = vmatmul.mubr.msk.bf16.vlgmr.msra.gmra.mxu1 %vm636_vm0, %v693_v22  ;;  %1589 = vmatmul.mubr.msk.bf16.vlgmr.msra.gmra.mxu0 %vm636_vm0, %v693_v22  ;;  %v1502_v22 = vld [vmem:[%s1961_s12] ss:$0 sm:$0xff] }
  0xe5   : > { %1593 = vmatpush3.bf16.msra.mxu1 %v1654_v23  ;;  %1601 = vmatpush3.bf16.msra.mxu0 %v1657_v6 }
  0xe6   : > { %1594 = vmatprep.subr.bf16.mxu1 %v1655_v24  ;;  %1602 = vmatprep.subr.bf16.mxu0 %v1659_v8 }
  0xe9   : > { %1595 = vmatpush3.bf16.msra.mxu1 %v1655_v24  ;;  %1603 = vmatpush3.bf16.msra.mxu0 %v1659_v8 }
  0xea   : > { %1608 = vmatprep.subr.bf16.mxu1 %v1656_v5  ;;  %1616 = vmatprep.subr.bf16.mxu0 %v1660_v20 }
 0x1a4   : > { %v1590_v26 = vpop.f32.mrf.mxu0  ;;  %v1582_v46 = vpop.f32.mrf.mxu1 }
 0x1a5   : > { %v838_v27 = vadd.f32 %v1590_v26, %v1483_v25  ;;  %v766_v62 = vadd.f32 %v1582_v46, %v1478_v53 }
 0x1a6   : > { %v829_v28 = vpop.f32.mrf.mxu0  ;;  %v757_v47 = vpop.f32.mrf.mxu1 }
 0x1a7   : > { %v1490_v29 = vmul.f32 -1.442695, %v838_v27  ;;  %v830_v30 = vadd.f32 %v1483_v25, %v829_v28  ;;  %v758_v59 = vadd.f32 %v1478_v53, %v757_v47 }
 0x1a8   : > { %v1591_v31 = vpop.f32.mrf.mxu0  ;;  %v1583_v48 = vpop.f32.mrf.mxu1 }
 0x1a9   : > { %1666 = vpow2.f32 %v1490_v29  ;;  %v1488_v32 = vmul.f32 -1.442695, %v830_v30  ;;  %v841_v33 = vadd.f32 %v1591_v31, %v1483_v25  ;;  %v769_v58 = vadd.f32 %v1583_v48, %v1478_v53 }
 0x1aa   : > { %v832_v34 = vpop.f32.mrf.mxu0  ;;  %v760_v52 = vpop.f32.mrf.mxu1 }
 0x1ab   : > { %1668 = vpow2.f32 %v1488_v32  ;;  %v1491_v35 = vmul.f32 -1.442695, %v841_v33  ;;  %v833_v36 = vadd.f32 %v1483_v25, %v832_v34  ;;  %v761_v60 = vadd.f32 %v1478_v53, %v760_v52 }
 0x1ad   : > { %1670 = vpow2.f32 %v1491_v35  ;;  %v1489_v37 = vmul.f32 -1.442695, %v833_v36 }
 0x1af   : > { %1672 = vpow2.f32 %v1489_v37 }
 0x1b6   : > { %v1667_v38 = vpop.eup %1666 }
 0x1b7   : > { %v858_v40 = vadd.f32 1.0, %v1667_v38 }
 0x1b8   : > { %v1669_v39 = vpop.eup %1668 }
 0x1b9   : > { %v856_v41 = vadd.f32 1.0, %v1669_v39 }
 0x1ba   : > { %v1671_v42 = vpop.eup %1670 }
 0x1bb   : > { %1674 = vrcp.f32 %v856_v41  ;;  %v859_v43 = vadd.f32 1.0, %v1671_v42 }
 0x1bc   : > { %v1673_v44 = vpop.eup %1672  ;;  %1676 = vrcp.f32 %v858_v40 }
 0x1bd   : > { %1678 = vrcp.f32 %v859_v43  ;;  %v857_v45 = vadd.f32 1.0, %v1673_v44 }
 0x1bf   : > { %1680 = vrcp.f32 %v857_v45 }
 0x1c8   : > { %v1675_v49 = vpop.eup %1674 }
 0x1c9   : > { %v1677_v50 = vpop.eup %1676  ;;  %v868_v54 = vmul.f32 %v1675_v49, %v830_v30 }
 0x1ca   : > { %v1679_v51 = vpop.eup %1678  ;;  %v870_v57 = vmul.f32 %v1677_v50, %v838_v27  ;;  %v1497_v50 = vld [vmem:[%s1959_s10] ss:$0 sm:$0xff] }
 0x1cb   : > { %v871_v55 = vmul.f32 %v1679_v51, %v841_v33  ;;  %v872_v0 = vmul.f32 %v868_v54, %v758_v59 }
 0x1cc   : > { %v1681_v56 = vpop.eup %1680  ;;  %v874_v2 = vmul.f32 %v870_v57, %v766_v62 }
 0x1cd   : > { %v869_v61 = vmul.f32 %v1681_v56, %v833_v36  ;;  %v875_v63 = vmul.f32 %v871_v55, %v769_v58 }
 0x1cf   : > { %v873_v1 = vmul.f32 %v869_v61, %v761_v60  ;;  %v877_v4 = vpack.c.bf16 %v875_v63, %v874_v2  ;;  %v1662_v2 = vld [vmem:[%s1966_s17 + $0x8] sm:$0xff]  }
 0x1d1   : > { %v876_v3 = vpack.c.bf16 %v873_v1, %v872_v0 }
 0x1d3   : > { %1596 = vmatprep.mubr.msk.bf16.mxu1 %vm636_vm0, %v876_v3  ;;  %v1663_v3 = vld [vmem:[%s1964_s15 + $0x8] sm:$0xff]  }
 0x1d4   : > { %1597 = vmatmul.mubr.msk.bf16.vlgmr.msra.gmra.mxu1 %vm636_vm0, %v877_v4  ;;  %v1664_v4 = vld [vmem:[%s1966_s17] sm:$0xff]  }
 0x1d5   : > { %1609 = vmatpush3.bf16.msra.mxu1 %v1656_v5  ;;  %v1665_v5 = vld [vmem:[%s1964_s15] sm:$0xff]  }
 0x1d6   : > { %1610 = vmatprep.subr.bf16.mxu1 %v1658_v7 }
 0x1d9   : > { %1611 = vmatpush3.bf16.msra.mxu1 %v1658_v7 }
 0x1da   : > { %1624 = vmatprep.subr.bf16.mxu1 %v1663_v3 }
 0x294   : > { %v1598_v9 = vpop.f32.mrf.mxu1 }
 0x295   : > { %v950_v17 = vadd.f32 %v1598_v9, %v1492_v12  ;;  %v1511_v9 = vld [vmem:[%s1963_s14] ss:$0 sm:$0xff] }
 0x296   : > { %v941_v10 = vpop.f32.mrf.mxu1 }
 0x297   : > { %v942_v15 = vadd.f32 %v1492_v12, %v941_v10 }
 0x298   : > { %v1599_v11 = vpop.f32.mrf.mxu1 }
 0x299   : > { %v953_v13 = vadd.f32 %v1599_v11, %v1492_v12 }
 0x29a   : > { %v944_v14 = vpop.f32.mrf.mxu1 }
 0x29b   : > { %v945_v16 = vadd.f32 %v1492_v12, %v944_v14  ;;  %v957_v19 = vpack.c.bf16 %v953_v13, %v950_v17  ;;  %v1521_v17 = vld [vmem:[%s1967_s18] ss:$0 sm:$0xff] }
 0x29d   : > { %v956_v18 = vpack.c.bf16 %v945_v16, %v942_v15 }
 0x29f   : > { %1604 = vmatprep.mubr.msk.bf16.mxu0 %vm636_vm0, %v956_v18  ;;  %1612 = vmatprep.mubr.msk.bf16.mxu1 %vm636_vm0, %v956_v18 }
 0x2a0   : > { %1605 = vmatmul.mubr.msk.bf16.vlgmr.msra.gmra.mxu0 %vm636_vm0, %v957_v19  ;;  %1613 = vmatmul.mubr.msk.bf16.vlgmr.msra.gmra.mxu1 %vm636_vm0, %v957_v19 }
 0x2a1   : > { %1617 = vmatpush3.bf16.msra.mxu0 %v1660_v20  ;;  %1625 = vmatpush3.bf16.msra.mxu1 %v1663_v3 }
 0x2a2   : > { %1618 = vmatprep.subr.bf16.mxu0 %v1661_v21  ;;  %1626 = vmatprep.subr.bf16.mxu1 %v1665_v5 }
 0x2a5   : > { %1619 = vmatpush3.bf16.msra.mxu0 %v1661_v21  ;;  %1627 = vmatpush3.bf16.msra.mxu1 %v1665_v5 }
 0x2a6   : > { %1632 = vmatprep.subr.bf16.mxu0 %v1662_v2 }
 0x360   : > { %v1614_v23 = vpop.f32.mrf.mxu1  ;;  %v1606_v43 = vpop.f32.mrf.mxu0 }
 0x361   : > { %v1102_v24 = vadd.f32 %v1614_v23, %v1502_v22  ;;  %v1030_v59 = vadd.f32 %v1606_v43, %v1497_v50 }
 0x362   : > { %v1093_v25 = vpop.f32.mrf.mxu1  ;;  %v1021_v44 = vpop.f32.mrf.mxu0 }
 0x363   : > { %v1509_v26 = vmul.f32 -1.442695, %v1102_v24  ;;  %v1094_v27 = vadd.f32 %v1502_v22, %v1093_v25  ;;  %v1022_v56 = vadd.f32 %v1497_v50, %v1021_v44 }
 0x364   : > { %v1615_v28 = vpop.f32.mrf.mxu1  ;;  %v1607_v45 = vpop.f32.mrf.mxu0 }
 0x365   : > { %1682 = vpow2.f32 %v1509_v26  ;;  %v1507_v29 = vmul.f32 -1.442695, %v1094_v27  ;;  %v1105_v30 = vadd.f32 %v1615_v28, %v1502_v22  ;;  %v1033_v55 = vadd.f32 %v1607_v45, %v1497_v50 }
 0x366   : > { %v1096_v31 = vpop.f32.mrf.mxu1  ;;  %v1024_v49 = vpop.f32.mrf.mxu0 }
 0x367   : > { %1684 = vpow2.f32 %v1507_v29  ;;  %v1510_v32 = vmul.f32 -1.442695, %v1105_v30  ;;  %v1097_v33 = vadd.f32 %v1502_v22, %v1096_v31  ;;  %v1025_v57 = vadd.f32 %v1497_v50, %v1024_v49 }
 0x369   : > { %1686 = vpow2.f32 %v1510_v32  ;;  %v1508_v34 = vmul.f32 -1.442695, %v1097_v33 }
 0x36b   : > { %1688 = vpow2.f32 %v1508_v34 }
 0x372   : > { %v1683_v35 = vpop.eup %1682 }
 0x373   : > { %v1122_v37 = vadd.f32 1.0, %v1683_v35 }
 0x374   : > { %v1685_v36 = vpop.eup %1684 }
 0x375   : > { %v1120_v38 = vadd.f32 1.0, %v1685_v36 }
 0x376   : > { %v1687_v39 = vpop.eup %1686 }
 0x377   : > { %1690 = vrcp.f32 %v1120_v38  ;;  %v1123_v40 = vadd.f32 1.0, %v1687_v39 }
 0x378   : > { %v1689_v41 = vpop.eup %1688  ;;  %1692 = vrcp.f32 %v1122_v37 }
 0x379   : > { %1694 = vrcp.f32 %v1123_v40  ;;  %v1121_v42 = vadd.f32 1.0, %v1689_v41  ;;  %v1516_v40 = vld [vmem:[%s1965_s16] ss:$0 sm:$0xff] }
 0x37b   : > { %1696 = vrcp.f32 %v1121_v42 }
 0x384   : > { %v1691_v46 = vpop.eup %1690 }
 0x385   : > { %v1693_v47 = vpop.eup %1692  ;;  %v1132_v51 = vmul.f32 %v1691_v46, %v1094_v27 }
 0x386   : > { %v1695_v48 = vpop.eup %1694  ;;  %v1134_v54 = vmul.f32 %v1693_v47, %v1102_v24 }
 0x387   : > { %v1135_v52 = vmul.f32 %v1695_v48, %v1105_v30  ;;  %v1136_v61 = vmul.f32 %v1132_v51, %v1022_v56 }
 0x388   : > { %v1697_v53 = vpop.eup %1696  ;;  %v1138_v63 = vmul.f32 %v1134_v54, %v1030_v59 }
 0x389   : > { %v1133_v58 = vmul.f32 %v1697_v53, %v1097_v33  ;;  %v1139_v60 = vmul.f32 %v1135_v52, %v1033_v55 }
 0x38b   : > { %v1137_v62 = vmul.f32 %v1133_v58, %v1025_v57  ;;  %v1141_v1 = vpack.c.bf16 %v1139_v60, %v1138_v63 }
 0x38d   : > { %v1140_v0 = vpack.c.bf16 %v1137_v62, %v1136_v61 }
 0x38f   : > { %1620 = vmatprep.mubr.msk.bf16.mxu0 %vm636_vm0, %v1140_v0 }
 0x390   : > { %1621 = vmatmul.mubr.msk.bf16.vlgmr.msra.gmra.mxu0 %vm636_vm0, %v1141_v1 }
 0x391   : > { %1633 = vmatpush3.bf16.msra.mxu0 %v1662_v2 }
 0x392   : > { %1634 = vmatprep.subr.bf16.mxu0 %v1664_v4 }
 0x395   : > { %1635 = vmatpush3.bf16.msra.mxu0 %v1664_v4 }
 0x450   : > { %v1622_v6 = vpop.f32.mrf.mxu0 }
 0x451   : > { %v1214_v14 = vadd.f32 %v1622_v6, %v1511_v9 }
 0x452   : > { %v1205_v7 = vpop.f32.mrf.mxu0 }
 0x453   : > { %v1206_v12 = vadd.f32 %v1511_v9, %v1205_v7 }
 0x454   : > { %v1623_v8 = vpop.f32.mrf.mxu0 }
 0x455   : > { %v1217_v10 = vadd.f32 %v1623_v8, %v1511_v9 }
 0x456   : > { %v1208_v11 = vpop.f32.mrf.mxu0 }
 0x457   : > { %v1209_v13 = vadd.f32 %v1511_v9, %v1208_v11  ;;  %v1221_v16 = vpack.c.bf16 %v1217_v10, %v1214_v14 }
 0x459   : > { %v1220_v15 = vpack.c.bf16 %v1209_v13, %v1206_v12 }
 0x45b   : > { %1628 = vmatprep.mubr.msk.bf16.mxu1 %vm636_vm0, %v1220_v15  ;;  %1636 = vmatprep.mubr.msk.bf16.mxu0 %vm636_vm0, %v1220_v15 }
 0x45c   : > { %1629 = vmatmul.mubr.msk.bf16.vlgmr.msra.gmra.mxu1 %vm636_vm0, %v1221_v16  ;;  %1637 = vmatmul.mubr.msk.bf16.vlgmr.msra.gmra.mxu0 %vm636_vm0, %v1221_v16 }
 0x51c   : > { %v1638_v18 = vpop.f32.mrf.mxu0  ;;  %v1630_v38 = vpop.f32.mrf.mxu1 }
 0x51d   : > { %v1366_v19 = vadd.f32 %v1638_v18, %v1521_v17  ;;  %v1294_v43 = vadd.f32 %v1630_v38, %v1516_v40 }
 0x51e   : > { %v1357_v20 = vpop.f32.mrf.mxu0  ;;  %v1285_v39 = vpop.f32.mrf.mxu1 }
 0x51f   : > { %v1528_v21 = vmul.f32 -1.442695, %v1366_v19  ;;  %v1358_v22 = vadd.f32 %v1521_v17, %v1357_v20  ;;  %v1286_v47 = vadd.f32 %v1516_v40, %v1285_v39 }
 0x520   : > { %v1639_v23 = vpop.f32.mrf.mxu0  ;;  %v1631_v42 = vpop.f32.mrf.mxu1 }
 0x521   : > { %1698 = vpow2.f32 %v1528_v21  ;;  %v1526_v24 = vmul.f32 -1.442695, %v1358_v22  ;;  %v1369_v25 = vadd.f32 %v1639_v23, %v1521_v17  ;;  %v1297_v52 = vadd.f32 %v1631_v42, %v1516_v40 }
 0x522   : > { %v1360_v26 = vpop.f32.mrf.mxu0  ;;  %v1288_v50 = vpop.f32.mrf.mxu1 }
 0x523   : > { %1700 = vpow2.f32 %v1526_v24  ;;  %v1529_v27 = vmul.f32 -1.442695, %v1369_v25  ;;  %v1361_v28 = vadd.f32 %v1521_v17, %v1360_v26  ;;  %v1289_v56 = vadd.f32 %v1516_v40, %v1288_v50 }
 0x525   : > { %1702 = vpow2.f32 %v1529_v27  ;;  %v1527_v29 = vmul.f32 -1.442695, %v1361_v28 }
 0x527   : > { %1704 = vpow2.f32 %v1527_v29 }
 0x52e   : > { %v1699_v30 = vpop.eup %1698 }
 0x52f   : > { %v1386_v31 = vadd.f32 1.0, %v1699_v30 }
 0x530   : > { %v1701_v32 = vpop.eup %1700 }
 0x531   : > { %1706 = vrcp.f32 %v1386_v31  ;;  %v1384_v33 = vadd.f32 1.0, %v1701_v32 }
 0x532   : > { %v1703_v34 = vpop.eup %1702 }
 0x533   : > { %1708 = vrcp.f32 %v1384_v33  ;;  %v1387_v35 = vadd.f32 1.0, %v1703_v34 }
 0x534   : > { %v1705_v36 = vpop.eup %1704 }
 0x535   : > { %1710 = vrcp.f32 %v1387_v35  ;;  %v1385_v37 = vadd.f32 1.0, %v1705_v36 }
 0x537   : > { %1712 = vrcp.f32 %v1385_v37 }
 0x53e   : > { %v1707_v41 = vpop.eup %1706 }
 0x53f   : > { %v1398_v44 = vmul.f32 %v1707_v41, %v1366_v19 }
 0x540   : > { %v1709_v45 = vpop.eup %1708 }
 0x541   : > { %v1402_v46 = vmul.f32 %v1398_v44, %v1294_v43  ;;  %v1396_v48 = vmul.f32 %v1709_v45, %v1358_v22 }
 0x542   : > { %v1711_v49 = vpop.eup %1710 }
 0x543   : > { %1406 = vst.msk [vmem:[%s604_s20 + $0x10] sm:$0xff] %vm636_vm0, %v1402_v46  ;;  %v1400_v51 = vmul.f32 %v1396_v48, %v1286_v47  ;;  %v1399_v53 = vmul.f32 %v1711_v49, %v1369_v25 }
 0x544   : > { %v1713_v54 = vpop.eup %1712 }
 0x545   : > { %1404 = vst.msk [vmem:[%s604_s20] sm:$0xff] %vm636_vm0, %v1400_v51  ;;  %v1403_v55 = vmul.f32 %v1399_v53, %v1297_v52  ;;  %v1397_v57 = vmul.f32 %v1713_v54, %v1361_v28 }
 0x547   : > { %1407 = vst.msk [vmem:[%s604_s20 + $0x18] sm:$0xff] %vm636_vm0, %v1403_v55  ;;  %v1401_v58 = vmul.f32 %v1397_v57, %v1289_v56 }
 0x549   : > { %1405 = vst.msk [vmem:[%s604_s20 + $0x8] sm:$0xff] %vm636_vm0, %v1401_v58 }
 0x54a PF: > { %s29_s0 = sadd.s32 1, %s1720_s0  }
 0x54b   : > { %p26_p4 = scmp.ge.s32.totalorder %s29_s0, 6  }
 0x54d   :  { %28 = sbr.rel (!%p26_p4) target bundleno = 5 (0x5), region = 126 }

// kernel: tpu_custom_call.1
= control target key start
LH: loop header
LB: loop body
LE: loop exit
PB: predicated region body
PF: predicated region fallthrough
CT: control target
= control target key end

     0   :  { %s1949_s0 = inlined_call_operand.vmem [shape: f32[128,32], index: 0, kind: input, shape index: {}]   ;;  %s1950_s1 = inlined_call_operand.vmem [shape: bf16[32,32], index: 1, kind: input, shape index: {}]   ;;  %s1951_s2 = inlined_call_operand.vmem [shape: f32[1,32], index: 2, kind: input, shape index: {}]   ;;  %s1952_s3 = inlined_call_operand.vmem [shape: bf16[32,32], index: 3, kind: input, shape index: {}]   ;;  %s1953_s4 = inlined_call_operand.vmem [shape: f32[1,32], index: 4, kind: input, shape index: {}]   ;;  %s1954_s5 = inlined_call_operand.vmem [shape: bf16[32,32], index: 5, kind: input, shape index: {}]   ;;  %s1955_s6 = inlined_call_operand.vmem [shape: f32[1,32], index: 6, kind: input, shape index: {}]   ;;  %s1956_s7 = inlined_call_operand.vmem [shape: bf16[32,32], index: 7, kind: input, shape index: {}]   ;;  %s1957_s8 = inlined_call_operand.vmem [shape: f32[1,32], index: 8, kind: input, shape index: {}]   ;;  %s1958_s9 = inlined_call_operand.vmem [shape: bf16[32,32], index: 9, kind: input, shape index: {}]   ;;  %s1959_s10 = inlined_call_operand.vmem [shape: f32[1,32], index: 10, kind: input, shape index: {}]   ;;  %s1960_s11 = inlined_call_operand.vmem [shape: bf16[32,32], index: 11, kind: input, shape index: {}]   ;;  %s1961_s12 = inlined_call_operand.vmem [shape: f32[1,32], index: 12, kind: input, shape index: {}]   ;;  %s1962_s13 = inlined_call_operand.vmem [shape: bf16[32,32], index: 13, kind: input, shape index: {}]   ;;  %s1963_s14 = inlined_call_operand.vmem [shape: f32[1,32], index: 14, kind: input, shape index: {}]   ;;  %s1964_s15 = inlined_call_operand.vmem [shape: bf16[32,32], index: 15, kind: input, shape index: {}]   ;;  %s1965_s16 = inlined_call_operand.vmem [shape: f32[1,32], index: 16, kind: input, shape index: {}]   ;;  %s1966_s17 = inlined_call_operand.vmem [shape: bf16[32,32], index: 17, kind: input, shape index: {}]   ;;  %s1967_s18 = inlined_call_operand.vmem [shape: f32[1,32], index: 18, kind: input, shape index: {}]   ;;  %s1968_s19 = inlined_call_operand.vmem [shape: f32[128,32], index: 19, kind: output, shape index: {}]  }
   0x1   :  { %1971 = sst [smem:[#allocation2_spill]] %s1949_s0  ;;  %s1822_s0 = smov 0  }
   0x2   :  { %1972 = sst [smem:[#allocation3_spill]] %s1950_s1 }
   0x3   :  { %1973 = sst [smem:[#allocation4_spill]] %s1951_s2 }
   0x4   :  { %1974 = sst [smem:[#allocation5_spill]] %s1952_s3 }
   0x5 LB: > { %s1464_s30 = sadd.s32 4294967295, %s1720_s0   ;;  %p1468_p0 = scmp.ge.s32.totalorder %s1720_s0, 1  ;;  %s1720_s0 = sphi %s1822_s0, %s29_s0  }
   0x6   : > { %p538_p1 = scmp.lt.s32.totalorder %s1720_s0, 5 }
   0x8   : > { %p539_p2 = pnand %p1468_p0, %p538_p1 }
   0x9   : > { %s1975_s1 = sld [smem:[#allocation3_spill]] (!%p539_p2)  ;;  %s1469_s22 = sshll.u32 (!%p539_p2), %s1464_s30, 2 }
   0xa   : > { %542 = sbr.rel (%p539_p2) target bundleno = 1354 (0x54a), region = 96  ;;  %p595_p3 = scmp.lt.s32.totalorder (!%p539_p2), %s1469_s22, 15 }
   0xb   : > { %s1976_s26 = sld [smem:[#allocation2_spill]] (!%p539_p2) }
   0xc   : > { %s1977_s21 = sld [smem:[#allocation5_spill]] (!%p539_p2) }
   0xd   : > { %s1978_s28 = sld [smem:[#allocation4_spill]] (!%p539_p2) }
   0xf   : > { %v1648_v0 = vld [vmem:[%s1975_s1 + $0x8] sm:$0xff]   ;;  %v1649_v1 = vld [vmem:[%s1975_s1] sm:$0xff]   ;;  %s1980_s22 = smov (!%p595_p3, %s1469_s22), 15  ;;  %vm636_vm0 = vcmask 261120  }
  0x10   : > { %1568 = vmatprep.subr.bf16.mxu0 %v1648_v0  ;;  %s1470_s24 = sshll.u32 %s1980_s22, 3  ;;  %v1650_v8 = vld [vmem:[%s1954_s5 + $0x8] sm:$0xff]   ;;  %v1652_v10 = vld [vmem:[%s1954_s5] sm:$0xff]  }
  0x11   : > { %1569 = vmatpush3.bf16.msra.mxu0 %v1648_v0  ;;  %s598_s27 = scalar_lea.vmem %s1976_s26, %s1470_s24  ;;  %v1654_v23 = vld [vmem:[%s1956_s7 + $0x8] sm:$0xff]   ;;  %v1655_v24 = vld [vmem:[%s1956_s7] sm:$0xff]   ;;  %s604_s20 = scalar_lea.vmem %s1968_s19, %s1470_s24 }
  0x12   : > { %1570 = vmatprep.subr.bf16.mxu0 %v1649_v1  ;;  %v607_v2 = vld [vmem:[%s598_s27] sm:$0xff]  ;;  %v608_v3 = vld [vmem:[%s598_s27 + $0x8] sm:$0xff]  ;;  %v609_v4 = vld [vmem:[%s598_s27 + $0x10] sm:$0xff] }
  0x13   : > { %v611_v5 = vpack.c.bf16 %v608_v3, %v607_v2  ;;  %v610_v6 = vld [vmem:[%s598_s27 + $0x18] sm:$0xff]  ;;  %v1651_v9 = vld [vmem:[%s1977_s21 + $0x8] sm:$0xff]   ;;  %v1653_v11 = vld [vmem:[%s1977_s21] sm:$0xff]  }
  0x14   : > { %v612_v7 = vpack.c.bf16 %v610_v6, %v609_v4  ;;  %1576 = vmatprep.subr.bf16.mxu1 %v1651_v9  ;;  %v1473_v15 = vld [vmem:[%s1978_s28] ss:$0 sm:$0xff]  ;;  %v1657_v6 = vld [vmem:[%s1958_s9 + $0x8] sm:$0xff]  }
  0x15   : > { %1571 = vmatpush3.bf16.msra.mxu0 %v1649_v1  ;;  %1572 = vmatprep.mubr.msk.bf16.mxu0 %vm636_vm0, %v611_v5  ;;  %v1483_v25 = vld [vmem:[%s1955_s6] ss:$0 sm:$0xff]  ;;  %v1656_v5 = vld [vmem:[%s1960_s11 + $0x8] sm:$0xff]  }
  0x16   : > { %1584 = vmatprep.subr.bf16.mxu0 %v1650_v8  ;;  %1577 = vmatpush3.bf16.msra.mxu1 %v1651_v9  ;;  %v1478_v53 = vld [vmem:[%s1953_s4] ss:$0 sm:$0xff] }
  0x17   : > { %1578 = vmatprep.subr.bf16.mxu1 %v1653_v11 }
  0x18   : > { %1573 = vmatmul.mubr.msk.bf16.vlgmr.msra.gmra.mxu0 %vm636_vm0, %v612_v7  ;;  %v1658_v7 = vld [vmem:[%s1960_s11] sm:$0xff]  }
  0x19   : > { %1585 = vmatpush3.bf16.msra.mxu0 %v1650_v8  ;;  %v1659_v8 = vld [vmem:[%s1958_s9] sm:$0xff]  }
  0x1a   : > { %1586 = vmatprep.subr.bf16.mxu0 %v1652_v10  ;;  %1579 = vmatpush3.bf16.msra.mxu1 %v1653_v11 }
  0x1b   : > { %1592 = vmatprep.subr.bf16.mxu1 %v1654_v23 }
  0x1d   : > { %1587 = vmatpush3.bf16.msra.mxu0 %v1652_v10 }
  0x1e   : > { %1600 = vmatprep.subr.bf16.mxu0 %v1657_v6 }
  0xd8   : > { %v1574_v12 = vpop.f32.mrf.mxu0 }
  0xd9   : > { %v686_v20 = vadd.f32 %v1574_v12, %v1473_v15  ;;  %v1492_v12 = vld [vmem:[%s1957_s8] ss:$0 sm:$0xff] }
  0xda   : > { %v677_v13 = vpop.f32.mrf.mxu0 }
  0xdb   : > { %v678_v18 = vadd.f32 %v1473_v15, %v677_v13 }
  0xdc   : > { %v1575_v14 = vpop.f32.mrf.mxu0 }
  0xdd   : > { %v689_v16 = vadd.f32 %v1575_v14, %v1473_v15 }
  0xde   : > { %v680_v17 = vpop.f32.mrf.mxu0 }
  0xdf   : > { %v681_v19 = vadd.f32 %v1473_v15, %v680_v17  ;;  %v693_v22 = vpack.c.bf16 %v689_v16, %v686_v20  ;;  %v1660_v20 = vld [vmem:[%s1962_s13 + $0x8] sm:$0xff]  }
  0xe1   : > { %v692_v21 = vpack.c.bf16 %v681_v19, %v678_v18 }
  0xe3   : > { %1580 = vmatprep.mubr.msk.bf16.mxu1 %vm636_vm0, %v692_v21  ;;  %1588 = vmatprep.mubr.msk.bf16.mxu0 %vm636_vm0, %v692_v21  ;;  %v1661_v21 = vld [vmem:[%s1962_s13] sm:$0xff]  }
  0xe4   : > { %1581 = vmatmul.mubr.msk.bf16.vlgmr.msra.gmra.mxu1 %vm636_vm0, %v693_v22  ;;  %1589 = vmatmul.mubr.msk.bf16.vlgmr.msra.gmra.mxu0 %vm636_vm0, %v693_v22  ;;  %v1502_v22 = vld [vmem:[%s1961_s12] ss:$0 sm:$0xff] }
  0xe5   : > { %1593 = vmatpush3.bf16.msra.mxu1 %v1654_v23  ;;  %1601 = vmatpush3.bf16.msra.mxu0 %v1657_v6 }
  0xe6   : > { %1594 = vmatprep.subr.bf16.mxu1 %v1655_v24  ;;  %1602 = vmatprep.subr.bf16.mxu0 %v1659_v8 }
  0xe9   : > { %1595 = vmatpush3.bf16.msra.mxu1 %v1655_v24  ;;  %1603 = vmatpush3.bf16.msra.mxu0 %v1659_v8 }
  0xea   : > { %1608 = vmatprep.subr.bf16.mxu1 %v1656_v5  ;;  %1616 = vmatprep.subr.bf16.mxu0 %v1660_v20 }
 0x1a4   : > { %v1590_v26 = vpop.f32.mrf.mxu0  ;;  %v1582_v46 = vpop.f32.mrf.mxu1 }
 0x1a5   : > { %v838_v27 = vadd.f32 %v1590_v26, %v1483_v25  ;;  %v766_v62 = vadd.f32 %v1582_v46, %v1478_v53 }
 0x1a6   : > { %v829_v28 = vpop.f32.mrf.mxu0  ;;  %v757_v47 = vpop.f32.mrf.mxu1 }
 0x1a7   : > { %v1490_v29 = vmul.f32 -1.442695, %v838_v27  ;;  %v830_v30 = vadd.f32 %v1483_v25, %v829_v28  ;;  %v758_v59 = vadd.f32 %v1478_v53, %v757_v47 }
 0x1a8   : > { %v1591_v31 = vpop.f32.mrf.mxu0  ;;  %v1583_v48 = vpop.f32.mrf.mxu1 }
 0x1a9   : > { %1666 = vpow2.f32 %v1490_v29  ;;  %v1488_v32 = vmul.f32 -1.442695, %v830_v30  ;;  %v841_v33 = vadd.f32 %v1591_v31, %v1483_v25  ;;  %v769_v58 = vadd.f32 %v1583_v48, %v1478_v53 }
 0x1aa   : > { %v832_v34 = vpop.f32.mrf.mxu0  ;;  %v760_v52 = vpop.f32.mrf.mxu1 }
 0x1ab   : > { %1668 = vpow2.f32 %v1488_v32  ;;  %v1491_v35 = vmul.f32 -1.442695, %v841_v33  ;;  %v833_v36 = vadd.f32 %v1483_v25, %v832_v34  ;;  %v761_v60 = vadd.f32 %v1478_v53, %v760_v52 }
 0x1ad   : > { %1670 = vpow2.f32 %v1491_v35  ;;  %v1489_v37 = vmul.f32 -1.442695, %v833_v36 }
 0x1af   : > { %1672 = vpow2.f32 %v1489_v37 }
 0x1b6   : > { %v1667_v38 = vpop.eup %1666 }
 0x1b7   : > { %v858_v40 = vadd.f32 1.0, %v1667_v38 }
 0x1b8   : > { %v1669_v39 = vpop.eup %1668 }
 0x1b9   : > { %v856_v41 = vadd.f32 1.0, %v1669_v39 }
 0x1ba   : > { %v1671_v42 = vpop.eup %1670 }
 0x1bb   : > { %1674 = vrcp.f32 %v856_v41  ;;  %v859_v43 = vadd.f32 1.0, %v1671_v42 }
 0x1bc   : > { %v1673_v44 = vpop.eup %1672  ;;  %1676 = vrcp.f32 %v858_v40 }
 0x1bd   : > { %1678 = vrcp.f32 %v859_v43  ;;  %v857_v45 = vadd.f32 1.0, %v1673_v44 }
 0x1bf   : > { %1680 = vrcp.f32 %v857_v45 }
 0x1c8   : > { %v1675_v49 = vpop.eup %1674 }
 0x1c9   : > { %v1677_v50 = vpop.eup %1676  ;;  %v868_v54 = vmul.f32 %v1675_v49, %v830_v30 }
 0x1ca   : > { %v1679_v51 = vpop.eup %1678  ;;  %v870_v57 = vmul.f32 %v1677_v50, %v838_v27  ;;  %v1497_v50 = vld [vmem:[%s1959_s10] ss:$0 sm:$0xff] }
 0x1cb   : > { %v871_v55 = vmul.f32 %v1679_v51, %v841_v33  ;;  %v872_v0 = vmul.f32 %v868_v54, %v758_v59 }
 0x1cc   : > { %v1681_v56 = vpop.eup %1680  ;;  %v874_v2 = vmul.f32 %v870_v57, %v766_v62 }
 0x1cd   : > { %v869_v61 = vmul.f32 %v1681_v56, %v833_v36  ;;  %v875_v63 = vmul.f32 %v871_v55, %v769_v58 }
 0x1cf   : > { %v873_v1 = vmul.f32 %v869_v61, %v761_v60  ;;  %v877_v4 = vpack.c.bf16 %v875_v63, %v874_v2  ;;  %v1662_v2 = vld [vmem:[%s1966_s17 + $0x8] sm:$0xff]  }
 0x1d1   : > { %v876_v3 = vpack.c.bf16 %v873_v1, %v872_v0 }
 0x1d3   : > { %1596 = vmatprep.mubr.msk.bf16.mxu1 %vm636_vm0, %v876_v3  ;;  %v1663_v3 = vld [vmem:[%s1964_s15 + $0x8] sm:$0xff]  }
 0x1d4   : > { %1597 = vmatmul.mubr.msk.bf16.vlgmr.msra.gmra.mxu1 %vm636_vm0, %v877_v4  ;;  %v1664_v4 = vld [vmem:[%s1966_s17] sm:$0xff]  }
 0x1d5   : > { %1609 = vmatpush3.bf16.msra.mxu1 %v1656_v5  ;;  %v1665_v5 = vld [vmem:[%s1964_s15] sm:$0xff]  }
 0x1d6   : > { %1610 = vmatprep.subr.bf16.mxu1 %v1658_v7 }
 0x1d9   : > { %1611 = vmatpush3.bf16.msra.mxu1 %v1658_v7 }
 0x1da   : > { %1624 = vmatprep.subr.bf16.mxu1 %v1663_v3 }
 0x294   : > { %v1598_v9 = vpop.f32.mrf.mxu1 }
 0x295   : > { %v950_v17 = vadd.f32 %v1598_v9, %v1492_v12  ;;  %v1511_v9 = vld [vmem:[%s1963_s14] ss:$0 sm:$0xff] }
 0x296   : > { %v941_v10 = vpop.f32.mrf.mxu1 }
 0x297   : > { %v942_v15 = vadd.f32 %v1492_v12, %v941_v10 }
 0x298   : > { %v1599_v11 = vpop.f32.mrf.mxu1 }
 0x299   : > { %v953_v13 = vadd.f32 %v1599_v11, %v1492_v12 }
 0x29a   : > { %v944_v14 = vpop.f32.mrf.mxu1 }
 0x29b   : > { %v945_v16 = vadd.f32 %v1492_v12, %v944_v14  ;;  %v957_v19 = vpack.c.bf16 %v953_v13, %v950_v17  ;;  %v1521_v17 = vld [vmem:[%s1967_s18] ss:$0 sm:$0xff] }
 0x29d   : > { %v956_v18 = vpack.c.bf16 %v945_v16, %v942_v15 }
 0x29f   : > { %1604 = vmatprep.mubr.msk.bf16.mxu0 %vm636_vm0, %v956_v18  ;;  %1612 = vmatprep.mubr.msk.bf16.mxu1 %vm636_vm0, %v956_v18 }
 0x2a0   : > { %1605 = vmatmul.mubr.msk.bf16.vlgmr.msra.gmra.mxu0 %vm636_vm0, %v957_v19  ;;  %1613 = vmatmul.mubr.msk.bf16.vlgmr.msra.gmra.mxu1 %vm636_vm0, %v957_v19 }
 0x2a1   : > { %1617 = vmatpush3.bf16.msra.mxu0 %v1660_v20  ;;  %1625 = vmatpush3.bf16.msra.mxu1 %v1663_v3 }
 0x2a2   : > { %1618 = vmatprep.subr.bf16.mxu0 %v1661_v21  ;;  %1626 = vmatprep.subr.bf16.mxu1 %v1665_v5 }
 0x2a5   : > { %1619 = vmatpush3.bf16.msra.mxu0 %v1661_v21  ;;  %1627 = vmatpush3.bf16.msra.mxu1 %v1665_v5 }
 0x2a6   : > { %1632 = vmatprep.subr.bf16.mxu0 %v1662_v2 }
 0x360   : > { %v1614_v23 = vpop.f32.mrf.mxu1  ;;  %v1606_v43 = vpop.f32.mrf.mxu0 }
 0x361   : > { %v1102_v24 = vadd.f32 %v1614_v23, %v1502_v22  ;;  %v1030_v59 = vadd.f32 %v1606_v43, %v1497_v50 }
 0x362   : > { %v1093_v25 = vpop.f32.mrf.mxu1  ;;  %v1021_v44 = vpop.f32.mrf.mxu0 }
 0x363   : > { %v1509_v26 = vmul.f32 -1.442695, %v1102_v24  ;;  %v1094_v27 = vadd.f32 %v1502_v22, %v1093_v25  ;;  %v1022_v56 = vadd.f32 %v1497_v50, %v1021_v44 }
 0x364   : > { %v1615_v28 = vpop.f32.mrf.mxu1  ;;  %v1607_v45 = vpop.f32.mrf.mxu0 }
 0x365   : > { %1682 = vpow2.f32 %v1509_v26  ;;  %v1507_v29 = vmul.f32 -1.442695, %v1094_v27  ;;  %v1105_v30 = vadd.f32 %v1615_v28, %v1502_v22  ;;  %v1033_v55 = vadd.f32 %v1607_v45, %v1497_v50 }
 0x366   : > { %v1096_v31 = vpop.f32.mrf.mxu1  ;;  %v1024_v49 = vpop.f32.mrf.mxu0 }
 0x367   : > { %1684 = vpow2.f32 %v1507_v29  ;;  %v1510_v32 = vmul.f32 -1.442695, %v1105_v30  ;;  %v1097_v33 = vadd.f32 %v1502_v22, %v1096_v31  ;;  %v1025_v57 = vadd.f32 %v1497_v50, %v1024_v49 }
 0x369   : > { %1686 = vpow2.f32 %v1510_v32  ;;  %v1508_v34 = vmul.f32 -1.442695, %v1097_v33 }
 0x36b   : > { %1688 = vpow2.f32 %v1508_v34 }
 0x372   : > { %v1683_v35 = vpop.eup %1682 }
 0x373   : > { %v1122_v37 = vadd.f32 1.0, %v1683_v35 }
 0x374   : > { %v1685_v36 = vpop.eup %1684 }
 0x375   : > { %v1120_v38 = vadd.f32 1.0, %v1685_v36 }
 0x376   : > { %v1687_v39 = vpop.eup %1686 }
 0x377   : > { %1690 = vrcp.f32 %v1120_v38  ;;  %v1123_v40 = vadd.f32 1.0, %v1687_v39 }
 0x378   : > { %v1689_v41 = vpop.eup %1688  ;;  %1692 = vrcp.f32 %v1122_v37 }
 0x379   : > { %1694 = vrcp.f32 %v1123_v40  ;;  %v1121_v42 = vadd.f32 1.0, %v1689_v41  ;;  %v1516_v40 = vld [vmem:[%s1965_s16] ss:$0 sm:$0xff] }
 0x37b   : > { %1696 = vrcp.f32 %v1121_v42 }
 0x384   : > { %v1691_v46 = vpop.eup %1690 }
 0x385   : > { %v1693_v47 = vpop.eup %1692  ;;  %v1132_v51 = vmul.f32 %v1691_v46, %v1094_v27 }
 0x386   : > { %v1695_v48 = vpop.eup %1694  ;;  %v1134_v54 = vmul.f32 %v1693_v47, %v1102_v24 }
 0x387   : > { %v1135_v52 = vmul.f32 %v1695_v48, %v1105_v30  ;;  %v1136_v61 = vmul.f32 %v1132_v51, %v1022_v56 }
 0x388   : > { %v1697_v53 = vpop.eup %1696  ;;  %v1138_v63 = vmul.f32 %v1134_v54, %v1030_v59 }
 0x389   : > { %v1133_v58 = vmul.f32 %v1697_v53, %v1097_v33  ;;  %v1139_v60 = vmul.f32 %v1135_v52, %v1033_v55 }
 0x38b   : > { %v1137_v62 = vmul.f32 %v1133_v58, %v1025_v57  ;;  %v1141_v1 = vpack.c.bf16 %v1139_v60, %v1138_v63 }
 0x38d   : > { %v1140_v0 = vpack.c.bf16 %v1137_v62, %v1136_v61 }
 0x38f   : > { %1620 = vmatprep.mubr.msk.bf16.mxu0 %vm636_vm0, %v1140_v0 }
 0x390   : > { %1621 = vmatmul.mubr.msk.bf16.vlgmr.msra.gmra.mxu0 %vm636_vm0, %v1141_v1 }
 0x391   : > { %1633 = vmatpush3.bf16.msra.mxu0 %v1662_v2 }
 0x392   : > { %1634 = vmatprep.subr.bf16.mxu0 %v1664_v4 }
 0x395   : > { %1635 = vmatpush3.bf16.msra.mxu0 %v1664_v4 }
 0x450   : > { %v1622_v6 = vpop.f32.mrf.mxu0 }
 0x451   : > { %v1214_v14 = vadd.f32 %v1622_v6, %v1511_v9 }
 0x452   : > { %v1205_v7 = vpop.f32.mrf.mxu0 }
 0x453   : > { %v1206_v12 = vadd.f32 %v1511_v9, %v1205_v7 }
 0x454   : > { %v1623_v8 = vpop.f32.mrf.mxu0 }
 0x455   : > { %v1217_v10 = vadd.f32 %v1623_v8, %v1511_v9 }
 0x456   : > { %v1208_v11 = vpop.f32.mrf.mxu0 }
 0x457   : > { %v1209_v13 = vadd.f32 %v1511_v9, %v1208_v11  ;;  %v1221_v16 = vpack.c.bf16 %v1217_v10, %v1214_v14 }
 0x459   : > { %v1220_v15 = vpack.c.bf16 %v1209_v13, %v1206_v12 }
 0x45b   : > { %1628 = vmatprep.mubr.msk.bf16.mxu1 %vm636_vm0, %v1220_v15  ;;  %1636 = vmatprep.mubr.msk.bf16.mxu0 %vm636_vm0, %v1220_v15 }
 0x45c   : > { %1629 = vmatmul.mubr.msk.bf16.vlgmr.msra.gmra.mxu1 %vm636_vm0, %v1221_v16  ;;  %1637 = vmatmul.mubr.msk.bf16.vlgmr.msra.gmra.mxu0 %vm636_vm0, %v1221_v16 }
 0x51c   : > { %v1638_v18 = vpop.f32.mrf.mxu0  ;;  %v1630_v38 = vpop.f32.mrf.mxu1 }
 0x51d   : > { %v1366_v19 = vadd.f32 %v1638_v18, %v1521_v17  ;;  %v1294_v43 = vadd.f32 %v1630_v38, %v1516_v40 }
 0x51e   : > { %v1357_v20 = vpop.f32.mrf.mxu0  ;;  %v1285_v39 = vpop.f32.mrf.mxu1 }
 0x51f   : > { %v1528_v21 = vmul.f32 -1.442695, %v1366_v19  ;;  %v1358_v22 = vadd.f32 %v1521_v17, %v1357_v20  ;;  %v1286_v47 = vadd.f32 %v1516_v40, %v1285_v39 }
 0x520   : > { %v1639_v23 = vpop.f32.mrf.mxu0  ;;  %v1631_v42 = vpop.f32.mrf.mxu1 }
 0x521   : > { %1698 = vpow2.f32 %v1528_v21  ;;  %v1526_v24 = vmul.f32 -1.442695, %v1358_v22  ;;  %v1369_v25 = vadd.f32 %v1639_v23, %v1521_v17  ;;  %v1297_v52 = vadd.f32 %v1631_v42, %v1516_v40 }
 0x522   : > { %v1360_v26 = vpop.f32.mrf.mxu0  ;;  %v1288_v50 = vpop.f32.mrf.mxu1 }
 0x523   : > { %1700 = vpow2.f32 %v1526_v24  ;;  %v1529_v27 = vmul.f32 -1.442695, %v1369_v25  ;;  %v1361_v28 = vadd.f32 %v1521_v17, %v1360_v26  ;;  %v1289_v56 = vadd.f32 %v1516_v40, %v1288_v50 }
 0x525   : > { %1702 = vpow2.f32 %v1529_v27  ;;  %v1527_v29 = vmul.f32 -1.442695, %v1361_v28 }
 0x527   : > { %1704 = vpow2.f32 %v1527_v29 }
 0x52e   : > { %v1699_v30 = vpop.eup %1698 }
 0x52f   : > { %v1386_v31 = vadd.f32 1.0, %v1699_v30 }
 0x530   : > { %v1701_v32 = vpop.eup %1700 }
 0x531   : > { %1706 = vrcp.f32 %v1386_v31  ;;  %v1384_v33 = vadd.f32 1.0, %v1701_v32 }
 0x532   : > { %v1703_v34 = vpop.eup %1702 }
 0x533   : > { %1708 = vrcp.f32 %v1384_v33  ;;  %v1387_v35 = vadd.f32 1.0, %v1703_v34 }
 0x534   : > { %v1705_v36 = vpop.eup %1704 }
 0x535   : > { %1710 = vrcp.f32 %v1387_v35  ;;  %v1385_v37 = vadd.f32 1.0, %v1705_v36 }
 0x537   : > { %1712 = vrcp.f32 %v1385_v37 }
 0x53e   : > { %v1707_v41 = vpop.eup %1706 }
 0x53f   : > { %v1398_v44 = vmul.f32 %v1707_v41, %v1366_v19 }
 0x540   : > { %v1709_v45 = vpop.eup %1708 }
 0x541   : > { %v1402_v46 = vmul.f32 %v1398_v44, %v1294_v43  ;;  %v1396_v48 = vmul.f32 %v1709_v45, %v1358_v22 }
 0x542   : > { %v1711_v49 = vpop.eup %1710 }
 0x543   : > { %1406 = vst.msk [vmem:[%s604_s20 + $0x10] sm:$0xff] %vm636_vm0, %v1402_v46  ;;  %v1400_v51 = vmul.f32 %v1396_v48, %v1286_v47  ;;  %v1399_v53 = vmul.f32 %v1711_v49, %v1369_v25 }
 0x544   : > { %v1713_v54 = vpop.eup %1712 }
 0x545   : > { %1404 = vst.msk [vmem:[%s604_s20] sm:$0xff] %vm636_vm0, %v1400_v51  ;;  %v1403_v55 = vmul.f32 %v1399_v53, %v1297_v52  ;;  %v1397_v57 = vmul.f32 %v1713_v54, %v1361_v28 }
 0x547   : > { %1407 = vst.msk [vmem:[%s604_s20 + $0x18] sm:$0xff] %vm636_vm0, %v1403_v55  ;;  %v1401_v58 = vmul.f32 %v1397_v57, %v1289_v56 }
 0x549   : > { %1405 = vst.msk [vmem:[%s604_s20 + $0x8] sm:$0xff] %vm636_vm0, %v1401_v58 }
 0x54a PF: > { %s29_s0 = sadd.s32 1, %s1720_s0  }
 0x54b   : > { %p26_p4 = scmp.ge.s32.totalorder %s29_s0, 6  }
 0x54d   :  { %28 = sbr.rel (!%p26_p4) target bundleno = 5 (0x5), region = 126 }

</bundles_post_ra>
